<compile_context>
chip_gen: v7x
topology: tpu7x:2x2x1
jax: 0.10.0
libtpu: 0.0.40
codegen_flags: <defaults>
</compile_context>

<pallas_src>
import jax
import jax.numpy as jnp
from jax.experimental import pallas as pl
from jax.experimental.pallas import tpu as pltpu


def _basic_block_v2_kernel(x_ref, w1_ref, w2_ref, s1_ref, b1_ref, sh2_ref,
                           o_ref, pad1_ref, pad2_ref):
    _, H, W, Cin = x_ref.shape
    Cmid = w1_ref.shape[2]
    Cout = w2_ref.shape[2]
    _, TH, _, _ = o_ref.shape
    Hc = TH + 2                 # conv1 rows computed: TH output rows + 1 halo each side

    j = pl.program_id(1)
    n_rb = pl.num_programs(1)
    r0 = pl.multiple_of(j * TH, TH)     # first output row handled by this tile

    s1 = s1_ref[...]            # (1, Cin) bn1 scale (fp32)
    b1 = b1_ref[...]            # (1, Cin) bn1 shift (fp32)

    def act1(rows):             # bn1 + ReLU on an (R, W, Cin) slab
        return jnp.maximum(rows.astype(jnp.float32) * s1 + b1, 0.0)

    def conv3x3(pad_ref, w_ref, rows, cin):
        # 9 shifted bf16 matmuls with fp32 accumulation; accumulator seeded
        # from the first tap so there is no explicit zero-init + add.
        acc = None
        for ky in range(3):
            for kx in range(3):
                tap = pad_ref[ky:ky + rows, kx:kx + W, :].reshape(rows * W, cin)
                p = jnp.dot(tap.astype(jnp.bfloat16), w_ref[ky * 3 + kx],
                            preferred_element_type=jnp.float32)
                acc = p if acc is None else acc + p
        return acc
    # TODO(synk): for tiny Cin an im2col operand (single matmul with K=9*Cin)
    # would raise MXU occupancy further; kept as 9 taps for robust lowering.

    # ---- stage conv1 input: bn1+ReLU of input rows [r0-2, r0+TH+1] with the
    #      1-pixel spatial zero padding.  Only the halo border is zero-filled.
    #      pad1 row t <-> input row (r0 - 2 + t); cols 0 / W+1 are the pad. ----
    zc1 = jnp.zeros((TH + 4, 1, Cin), jnp.float32)
    pad1_ref[:, 0:1, :] = zc1                       # left pad column
    pad1_ref[:, W + 1:W + 2, :] = zc1               # right pad column
    pad1_ref[2:TH + 2, 1:W + 1, :] = act1(x_ref[0, pl.ds(r0, TH), :, :])

    @pl.when(j > 0)                                 # top halo rows exist
    def _():
        pad1_ref[0:2, 1:W + 1, :] = act1(x_ref[0, pl.ds(r0 - 2, 2), :, :])

    @pl.when(j == 0)                                # image top: zero padding
    def _():
        pad1_ref[0:2, :, :] = jnp.zeros((2, W + 2, Cin), jnp.float32)

    @pl.when(j < n_rb - 1)                          # bottom halo rows exist
    def _():
        pad1_ref[TH + 2:TH + 4, 1:W + 1, :] = act1(
            x_ref[0, pl.ds(r0 + TH, 2), :, :])

    @pl.when(j == n_rb - 1)                         # image bottom: zero padding
    def _():
        pad1_ref[TH + 2:TH + 4, :, :] = jnp.zeros((2, W + 2, Cin), jnp.float32)

    # ---- conv1 (3x3, stride 1) ----
    acc1 = conv3x3(pad1_ref, w1_ref, Hc, Cin)       # (Hc*W, Cmid) fp32

    # ---- bn2 (scale already folded into w1) + ReLU ----
    h2 = jnp.maximum(acc1 + sh2_ref[...], 0.0)      # (Hc*W, Cmid) fp32

    # ---- stage conv2 input: h2 rows [r0-1, r0+TH] with 1-pixel zero padding.
    #      Halo rows falling outside the image are conv2's zero padding. ----
    zc2 = jnp.zeros((Hc, 1, Cmid), jnp.float32)
    pad2_ref[:, 0:1, :] = zc2
    pad2_ref[:, W + 1:W + 2, :] = zc2
    pad2_ref[:, 1:W + 1, :] = h2.reshape(Hc, W, Cmid)

    @pl.when(j == 0)
    def _():
        pad2_ref[0:1, :, :] = jnp.zeros((1, W + 2, Cmid), jnp.float32)

    @pl.when(j == n_rb - 1)
    def _():
        pad2_ref[Hc - 1:Hc, :, :] = jnp.zeros((1, W + 2, Cmid), jnp.float32)

    # ---- conv2 (3x3, stride 1) ----
    acc2 = conv3x3(pad2_ref, w2_ref, TH, Cmid)      # (TH*W, Cout) fp32

    # ---- residual add (downsample=None path).  x is re-read here so its live
    #      range does not span both convolutions. ----
    xres = x_ref[0, pl.ds(r0, TH), :, :].astype(jnp.float32).reshape(TH * W, Cin)
    o_ref[...] = (acc2 + xres).reshape(1, TH, W, Cout).astype(o_ref.dtype)


def _pick_row_tile(Ho, row_tile):
    """Largest divisor of Ho that is >= 2 and <= row_tile; fall back to Ho."""
    for d in range(min(row_tile, Ho), 1, -1):
        if Ho % d == 0:
            return d
    return Ho


def basic_block_v2(x_nchw, params, *, stride=1, eps=1e-5, row_tile=8):
    """Pre-activation basic block (eval-mode BN). x_nchw: (N, C, H, W) fp32."""
    g1, be1, m1, v1 = params["bn1"]
    scale1 = g1 / jnp.sqrt(v1 + eps)
    shift1 = be1 - m1 * scale1
    g2, be2, m2, v2 = params["bn2"]
    scale2 = g2 / jnp.sqrt(v2 + eps)
    shift2 = be2 - m2 * scale2

    # PyTorch conv weights are OIHW -> HWIO for the NHWC kernel.
    w1 = jnp.transpose(params["conv1_w"], (2, 3, 1, 0))   # (3,3,Cin,Cmid)
    w2 = jnp.transpose(params["conv2_w"], (2, 3, 1, 0))   # (3,3,Cmid,Cout)
    Cin, Cmid = w1.shape[2], w1.shape[3]
    Cout = w2.shape[3]

    # Fold bn2's scale into conv1's output channels; feed the MXU bf16.
    w1 = w1 * scale2[None, None, None, :]
    w1m = w1.reshape(9, Cin, Cmid).astype(jnp.bfloat16)
    w2m = w2.reshape(9, Cmid, Cout).astype(jnp.bfloat16)

    x = jnp.transpose(x_nchw, (0, 2, 3, 1))               # NCHW -> NHWC
    N, H, W, _ = x.shape
    assert stride == 1 and Cin == Cout, "downsample=None path only"
    # TODO(synk): strided conv1 + non-None downsample (1x1 conv) branch is not
    # implemented (it is None in this configuration).
    Ho, Wo = H, W

    TH = _pick_row_tile(Ho, row_tile)
    n_rb = Ho // TH

    flops = 2 * 9 * N * Ho * Wo * (Cin * Cmid + Cmid * Cout)
    bytes_accessed = 4 * (x.size + N * Ho * Wo * Cout) + 2 * (w1m.size + w2m.size)

    out = pl.pallas_call(
        _basic_block_v2_kernel,
        out_shape=jax.ShapeDtypeStruct((N, Ho, Wo, Cout), x.dtype),
        grid=(N, n_rb),
        in_specs=[
            # Full image per batch element; the block index ignores the row
            # axis, so it is DMA'd once per batch element and reused across
            # the inner row-block iterations (halo rows come from VMEM).
            pl.BlockSpec((1, H, W, Cin), lambda n, j: (n, 0, 0, 0)),
            pl.BlockSpec((9, Cin, Cmid), lambda n, j: (0, 0, 0)),
            pl.BlockSpec((9, Cmid, Cout), lambda n, j: (0, 0, 0)),
            pl.BlockSpec((1, Cin), lambda n, j: (0, 0)),   # bn1 scale
            pl.BlockSpec((1, Cin), lambda n, j: (0, 0)),   # bn1 shift
            pl.BlockSpec((1, Cmid), lambda n, j: (0, 0)),  # bn2 shift
        ],
        out_specs=pl.BlockSpec((1, TH, Wo, Cout), lambda n, j: (n, j, 0, 0)),
        scratch_shapes=[
            pltpu.VMEM((TH + 4, W + 2, Cin), jnp.float32),   # padded conv1 rows
            pltpu.VMEM((TH + 2, W + 2, Cmid), jnp.float32),  # padded conv2 rows
        ],
        compiler_params=pltpu.CompilerParams(
            # Every (batch, row-block) tile is independent -> both parallel,
            # so megacore can shard over rows even at batch < #cores.
            dimension_semantics=("parallel", "parallel"),
            vmem_limit_bytes=32 * 1024 * 1024,
        ),
        cost_estimate=pl.CostEstimate(flops=int(flops), transcendentals=0,
                                      bytes_accessed=int(bytes_accessed)),
    )(
        x, w1m, w2m,
        scale1.reshape(1, Cin).astype(jnp.float32),
        shift1.reshape(1, Cin).astype(jnp.float32),
        shift2.reshape(1, Cmid).astype(jnp.float32),
    )
    return jnp.transpose(out, (0, 3, 1, 2))                # NHWC -> NCHW


def reference(x, params, *, stride=1, eps=1e-5):
    """Plain-JAX fp32 reference of the same forward pass (NCHW)."""
    def bn(h, p):
        g, b, m, v = p
        bc = lambda a: a[None, :, None, None]
        return (h - bc(m)) / jnp.sqrt(bc(v) + eps) * bc(g) + bc(b)

    def conv3x3(h, w, s):
        return jax.lax.conv_general_dilated(
            h, w, (s, s), ((1, 1), (1, 1)),
            dimension_numbers=("NCHW", "OIHW", "NCHW"))

    residual = x
    out = jnp.maximum(bn(x, params["bn1"]), 0.0)
    out = conv3x3(out, params["conv1_w"], stride)
    out = jnp.maximum(bn(out, params["bn2"]), 0.0)
    out = conv3x3(out, params["conv2_w"], 1)
    return out + residual


if __name__ == "__main__":
    key = jax.random.PRNGKey(0)
    N, C, Hs, Ws = 2, 4, 16, 16      # inplanes = planes = 4, stride = 1
    inplanes = planes = C
    ks = jax.random.split(key, 11)

    x = jax.random.normal(ks[0], (N, C, Hs, Ws), jnp.float32)
    params = {
        "bn1": (1.0 + 0.1 * jax.random.normal(ks[1], (inplanes,), jnp.float32),
                0.1 * jax.random.normal(ks[2], (inplanes,), jnp.float32),
                0.1 * jax.random.normal(ks[3], (inplanes,), jnp.float32),
                jax.random.uniform(ks[4], (inplanes,), jnp.float32, 0.5, 1.5)),
        "conv1_w": 0.1 * jax.random.normal(ks[5], (planes, inplanes, 3, 3),
                                           jnp.float32),
        "bn2": (1.0 + 0.1 * jax.random.normal(ks[6], (planes,), jnp.float32),
                0.1 * jax.random.normal(ks[7], (planes,), jnp.float32),
                0.1 * jax.random.normal(ks[8], (planes,), jnp.float32),
                jax.random.uniform(ks[9], (planes,), jnp.float32, 0.5, 1.5)),
        "conv2_w": 0.1 * jax.random.normal(ks[10], (planes, planes, 3, 3),
                                           jnp.float32),
    }

    out = basic_block_v2(x, params, stride=1)
    out = jax.block_until_ready(out)

    ref = reference(x, params, stride=1)
    if out.shape != ref.shape:
        raise AssertionError(f"shape mismatch: {out.shape} vs {ref.shape}")
    # bf16 matmul inputs (fp32 accumulation) -> compare against the fp32
    # reference with a bf16-appropriate tolerance.
    if not bool(jnp.allclose(out, ref, atol=2e-2, rtol=2e-2)):
        max_err = float(jnp.max(jnp.abs(out - ref)))
        raise AssertionError(f"numerical mismatch, max abs err = {max_err}")

    print("KERNEL_OK")
</pallas_src>

<mosaic_0001>
module attributes {stable_mosaic.version = 11 : i64} {
  func.func @_basic_block_v2_kernel(%arg0: i32, %arg1: i32, %arg2: memref<1x16x16x4xf32, #tpu.memory_space<vmem>>, %arg3: memref<9x4x4xbf16, #tpu.memory_space<vmem>>, %arg4: memref<9x4x4xbf16, #tpu.memory_space<vmem>>, %arg5: memref<1x4xf32, #tpu.memory_space<vmem>>, %arg6: memref<1x4xf32, #tpu.memory_space<vmem>>, %arg7: memref<1x4xf32, #tpu.memory_space<vmem>>, %arg8: memref<1x8x16x4xf32, #tpu.memory_space<vmem>>, %arg9: memref<12x18x4xf32, #tpu.memory_space<vmem>>, %arg10: memref<10x18x4xf32, #tpu.memory_space<vmem>>) attributes {dimension_semantics = [#tpu.dimension_semantics<parallel>, #tpu.dimension_semantics<parallel>], iteration_bounds = array<i64: 2, 2>, scalar_prefetch = 0 : i64, scratch_operands = 2 : i64, tpu.core_type = #tpu.core_type<tc>, window_params = [{transform_indices = @transform_0, window_bounds = array<i64: 1, 16, 16, 4>}, {pipeline_mode = #tpu.pipeline_mode<synchronous>, transform_indices = @transform_1, window_bounds = array<i64: 9, 4, 4>}, {pipeline_mode = #tpu.pipeline_mode<synchronous>, transform_indices = @transform_2, window_bounds = array<i64: 9, 4, 4>}, {pipeline_mode = #tpu.pipeline_mode<synchronous>, transform_indices = @transform_3, window_bounds = array<i64: 1, 4>}, {pipeline_mode = #tpu.pipeline_mode<synchronous>, transform_indices = @transform_4, window_bounds = array<i64: 1, 4>}, {pipeline_mode = #tpu.pipeline_mode<synchronous>, transform_indices = @transform_5, window_bounds = array<i64: 1, 4>}, {transform_indices = @transform_6, window_bounds = array<i64: 1, 8, 16, 4>}]} {
    %c8_i32 = arith.constant 8 : i32
    %0 = arith.muli %arg1, %c8_i32 : i32
    %1 = tpu.assume_multiple %0, 8 : i32
    %c0 = arith.constant 0 : index
    %c0_0 = arith.constant 0 : index
    %2 = vector.load %arg5[%c0, %c0_0] : memref<1x4xf32, #tpu.memory_space<vmem>>, vector<1x4xf32>
    %c0_1 = arith.constant 0 : index
    %c0_2 = arith.constant 0 : index
    %3 = vector.load %arg6[%c0_1, %c0_2] : memref<1x4xf32, #tpu.memory_space<vmem>>, vector<1x4xf32>
    %cst = arith.constant 0.000000e+00 : f32
    %4 = vector.broadcast %cst : f32 to vector<12x1x4xf32>
    %c0_3 = arith.constant 0 : index
    %c0_4 = arith.constant 0 : index
    %c0_5 = arith.constant 0 : index
    %5 = vector.load %arg9[%c0_3, %c0_4, %c0_5] : memref<12x18x4xf32, #tpu.memory_space<vmem>>, vector<12x1x4xf32>
    tpu.vector_store %arg9[%c0_3, %c0_4, %c0_5], %4 {strides = array<i32>} : memref<12x18x4xf32, #tpu.memory_space<vmem>>, vector<12x1x4xf32>,
    %c0_6 = arith.constant 0 : index
    %c17 = arith.constant 17 : index
    %c0_7 = arith.constant 0 : index
    %6 = vector.load %arg9[%c0_6, %c17, %c0_7] : memref<12x18x4xf32, #tpu.memory_space<vmem>>, vector<12x1x4xf32>
    tpu.vector_store %arg9[%c0_6, %c17, %c0_7], %4 {strides = array<i32>} : memref<12x18x4xf32, #tpu.memory_space<vmem>>, vector<12x1x4xf32>,
    %c0_8 = arith.constant 0 : index
    %7 = arith.index_cast %1 : i32 to index
    %c0_9 = arith.constant 0 : index
    %c0_10 = arith.constant 0 : index
    %8 = vector.load %arg2[%c0_8, %7, %c0_9, %c0_10] : memref<1x16x16x4xf32, #tpu.memory_space<vmem>>, vector<1x8x16x4xf32>
    %9 = vector.shape_cast %8 : vector<1x8x16x4xf32> to vector<8x16x4xf32>
    %10 = vector.shape_cast %2 : vector<1x4xf32> to vector<1x1x4xf32>
    %11 = vector.broadcast %10 : vector<1x1x4xf32> to vector<8x16x4xf32>
    %12 = arith.mulf %9, %11 : vector<8x16x4xf32>
    %13 = vector.shape_cast %3 : vector<1x4xf32> to vector<1x1x4xf32>
    %14 = vector.broadcast %13 : vector<1x1x4xf32> to vector<8x16x4xf32>
    %15 = arith.addf %12, %14 : vector<8x16x4xf32>
    %cst_11 = arith.constant 0.000000e+00 : f32
    %16 = vector.broadcast %cst_11 : f32 to vector<8x16x4xf32>
    %17 = arith.maximumf %15, %16 : vector<8x16x4xf32>
    %c2 = arith.constant 2 : index
    %c1 = arith.constant 1 : index
    %c0_12 = arith.constant 0 : index
    %18 = vector.load %arg9[%c2, %c1, %c0_12] : memref<12x18x4xf32, #tpu.memory_space<vmem>>, vector<8x16x4xf32>
    tpu.vector_store %arg9[%c2, %c1, %c0_12], %17 {strides = array<i32>} : memref<12x18x4xf32, #tpu.memory_space<vmem>>, vector<8x16x4xf32>,
    %c0_i32 = arith.constant 0 : i32
    %19 = arith.cmpi sgt, %arg1, %c0_i32 : i32
    %20 = arith.extui %19 : i1 to i32
    %c0_i32_13 = arith.constant 0 : i32
    %21 = arith.cmpi ne, %20, %c0_i32_13 : i32
    scf.if %21 {
      %c2_i32 = arith.constant 2 : i32
      %178 = arith.subi %1, %c2_i32 : i32
      %c0_163 = arith.constant 0 : index
      %179 = arith.index_cast %178 : i32 to index
      %c0_164 = arith.constant 0 : index
      %c0_165 = arith.constant 0 : index
      %180 = vector.load %arg2[%c0_163, %179, %c0_164, %c0_165] : memref<1x16x16x4xf32, #tpu.memory_space<vmem>>, vector<1x2x16x4xf32>
      %181 = vector.shape_cast %180 : vector<1x2x16x4xf32> to vector<2x16x4xf32>
      %182 = vector.shape_cast %2 : vector<1x4xf32> to vector<1x1x4xf32>
      %183 = vector.broadcast %182 : vector<1x1x4xf32> to vector<2x16x4xf32>
      %184 = arith.mulf %181, %183 : vector<2x16x4xf32>
      %185 = vector.shape_cast %3 : vector<1x4xf32> to vector<1x1x4xf32>
      %186 = vector.broadcast %185 : vector<1x1x4xf32> to vector<2x16x4xf32>
      %187 = arith.addf %184, %186 : vector<2x16x4xf32>
      %cst_166 = arith.constant 0.000000e+00 : f32
      %188 = vector.broadcast %cst_166 : f32 to vector<2x16x4xf32>
      %189 = arith.maximumf %187, %188 : vector<2x16x4xf32>
      %c0_167 = arith.constant 0 : index
      %c1_168 = arith.constant 1 : index
      %c0_169 = arith.constant 0 : index
      %190 = vector.load %arg9[%c0_167, %c1_168, %c0_169] : memref<12x18x4xf32, #tpu.memory_space<vmem>>, vector<2x16x4xf32>
      tpu.vector_store %arg9[%c0_167, %c1_168, %c0_169], %189 {strides = array<i32>} : memref<12x18x4xf32, #tpu.memory_space<vmem>>, vector<2x16x4xf32>,
    } else {
    }
    %c0_i32_14 = arith.constant 0 : i32
    %22 = arith.cmpi eq, %arg1, %c0_i32_14 : i32
    %23 = arith.extui %22 : i1 to i32
    %c0_i32_15 = arith.constant 0 : i32
    %24 = arith.cmpi ne, %23, %c0_i32_15 : i32
    scf.if %24 {
      %cst_163 = arith.constant 0.000000e+00 : f32
      %178 = vector.broadcast %cst_163 : f32 to vector<2x18x4xf32>
      %c0_164 = arith.constant 0 : index
      %c0_165 = arith.constant 0 : index
      %c0_166 = arith.constant 0 : index
      %179 = vector.load %arg9[%c0_164, %c0_165, %c0_166] : memref<12x18x4xf32, #tpu.memory_space<vmem>>, vector<2x18x4xf32>
      tpu.vector_store %arg9[%c0_164, %c0_165, %c0_166], %178 {strides = array<i32>} : memref<12x18x4xf32, #tpu.memory_space<vmem>>, vector<2x18x4xf32>,
    } else {
    }
    %c1_i32 = arith.constant 1 : i32
    %25 = arith.cmpi slt, %arg1, %c1_i32 : i32
    %26 = arith.extui %25 : i1 to i32
    %c0_i32_16 = arith.constant 0 : i32
    %27 = arith.cmpi ne, %26, %c0_i32_16 : i32
    scf.if %27 {
      %c8_i32_163 = arith.constant 8 : i32
      %178 = arith.addi %1, %c8_i32_163 : i32
      %c0_164 = arith.constant 0 : index
      %179 = arith.index_cast %178 : i32 to index
      %c0_165 = arith.constant 0 : index
      %c0_166 = arith.constant 0 : index
      %180 = vector.load %arg2[%c0_164, %179, %c0_165, %c0_166] : memref<1x16x16x4xf32, #tpu.memory_space<vmem>>, vector<1x2x16x4xf32>
      %181 = vector.shape_cast %180 : vector<1x2x16x4xf32> to vector<2x16x4xf32>
      %182 = vector.shape_cast %2 : vector<1x4xf32> to vector<1x1x4xf32>
      %183 = vector.broadcast %182 : vector<1x1x4xf32> to vector<2x16x4xf32>
      %184 = arith.mulf %181, %183 : vector<2x16x4xf32>
      %185 = vector.shape_cast %3 : vector<1x4xf32> to vector<1x1x4xf32>
      %186 = vector.broadcast %185 : vector<1x1x4xf32> to vector<2x16x4xf32>
      %187 = arith.addf %184, %186 : vector<2x16x4xf32>
      %cst_167 = arith.constant 0.000000e+00 : f32
      %188 = vector.broadcast %cst_167 : f32 to vector<2x16x4xf32>
      %189 = arith.maximumf %187, %188 : vector<2x16x4xf32>
      %c10 = arith.constant 10 : index
      %c1_168 = arith.constant 1 : index
      %c0_169 = arith.constant 0 : index
      %190 = vector.load %arg9[%c10, %c1_168, %c0_169] : memref<12x18x4xf32, #tpu.memory_space<vmem>>, vector<2x16x4xf32>
      tpu.vector_store %arg9[%c10, %c1_168, %c0_169], %189 {strides = array<i32>} : memref<12x18x4xf32, #tpu.memory_space<vmem>>, vector<2x16x4xf32>,
    } else {
    }
    %c1_i32_17 = arith.constant 1 : i32
    %28 = arith.cmpi eq, %arg1, %c1_i32_17 : i32
    %29 = arith.extui %28 : i1 to i32
    %c0_i32_18 = arith.constant 0 : i32
    %30 = arith.cmpi ne, %29, %c0_i32_18 : i32
    scf.if %30 {
      %cst_163 = arith.constant 0.000000e+00 : f32
      %178 = vector.broadcast %cst_163 : f32 to vector<2x18x4xf32>
      %c10 = arith.constant 10 : index
      %c0_164 = arith.constant 0 : index
      %c0_165 = arith.constant 0 : index
      %179 = vector.load %arg9[%c10, %c0_164, %c0_165] : memref<12x18x4xf32, #tpu.memory_space<vmem>>, vector<2x18x4xf32>
      tpu.vector_store %arg9[%c10, %c0_164, %c0_165], %178 {strides = array<i32>} : memref<12x18x4xf32, #tpu.memory_space<vmem>>, vector<2x18x4xf32>,
    } else {
    }
    %c0_19 = arith.constant 0 : index
    %c0_20 = arith.constant 0 : index
    %c0_21 = arith.constant 0 : index
    %31 = vector.load %arg9[%c0_19, %c0_20, %c0_21] : memref<12x18x4xf32, #tpu.memory_space<vmem>>, vector<10x16x4xf32>
    %32 = vector.shape_cast %31 : vector<10x16x4xf32> to vector<160x4xf32>
    %33 = arith.truncf %32 : vector<160x4xf32> to vector<160x4xbf16>
    %c0_22 = arith.constant 0 : index
    %c0_23 = arith.constant 0 : index
    %c0_24 = arith.constant 0 : index
    %34 = vector.load %arg3[%c0_22, %c0_23, %c0_24] : memref<9x4x4xbf16, #tpu.memory_space<vmem>>, vector<1x4x4xbf16>
    %35 = vector.shape_cast %34 : vector<1x4x4xbf16> to vector<4x4xbf16>
    %cst_25 = arith.constant dense<0.000000e+00> : vector<160x4xf32>
    %36 = tpu.matmul %33, %35, %cst_25 {dimension_numbers = #tpu.dot_dimension_numbers<[1], [0], [0], [1], [0, 0, 1, 1], [], []>} : vector<160x4xbf16>, vector<4x4xbf16>, vector<160x4xf32> -> vector<160x4xf32>
    %c0_26 = arith.constant 0 : index
    %c1_27 = arith.constant 1 : index
    %c0_28 = arith.constant 0 : index
    %37 = vector.load %arg9[%c0_26, %c1_27, %c0_28] : memref<12x18x4xf32, #tpu.memory_space<vmem>>, vector<10x16x4xf32>
    %38 = vector.shape_cast %37 : vector<10x16x4xf32> to vector<160x4xf32>
    %39 = arith.truncf %38 : vector<160x4xf32> to vector<160x4xbf16>
    %c1_29 = arith.constant 1 : index
    %c0_30 = arith.constant 0 : index
    %c0_31 = arith.constant 0 : index
    %40 = vector.load %arg3[%c1_29, %c0_30, %c0_31] : memref<9x4x4xbf16, #tpu.memory_space<vmem>>, vector<1x4x4xbf16>
    %41 = vector.shape_cast %40 : vector<1x4x4xbf16> to vector<4x4xbf16>
    %cst_32 = arith.constant dense<0.000000e+00> : vector<160x4xf32>
    %42 = tpu.matmul %39, %41, %cst_32 {dimension_numbers = #tpu.dot_dimension_numbers<[1], [0], [0], [1], [0, 0, 1, 1], [], []>} : vector<160x4xbf16>, vector<4x4xbf16>, vector<160x4xf32> -> vector<160x4xf32>
    %43 = arith.addf %36, %42 : vector<160x4xf32>
    %c0_33 = arith.constant 0 : index
    %c2_34 = arith.constant 2 : index
    %c0_35 = arith.constant 0 : index
    %44 = vector.load %arg9[%c0_33, %c2_34, %c0_35] : memref<12x18x4xf32, #tpu.memory_space<vmem>>, vector<10x16x4xf32>
    %45 = vector.shape_cast %44 : vector<10x16x4xf32> to vector<160x4xf32>
    %46 = arith.truncf %45 : vector<160x4xf32> to vector<160x4xbf16>
    %c2_36 = arith.constant 2 : index
    %c0_37 = arith.constant 0 : index
    %c0_38 = arith.constant 0 : index
    %47 = vector.load %arg3[%c2_36, %c0_37, %c0_38] : memref<9x4x4xbf16, #tpu.memory_space<vmem>>, vector<1x4x4xbf16>
    %48 = vector.shape_cast %47 : vector<1x4x4xbf16> to vector<4x4xbf16>
    %cst_39 = arith.constant dense<0.000000e+00> : vector<160x4xf32>
    %49 = tpu.matmul %46, %48, %cst_39 {dimension_numbers = #tpu.dot_dimension_numbers<[1], [0], [0], [1], [0, 0, 1, 1], [], []>} : vector<160x4xbf16>, vector<4x4xbf16>, vector<160x4xf32> -> vector<160x4xf32>
    %50 = arith.addf %43, %49 : vector<160x4xf32>
    %c1_40 = arith.constant 1 : index
    %c0_41 = arith.constant 0 : index
    %c0_42 = arith.constant 0 : index
    %51 = vector.load %arg9[%c1_40, %c0_41, %c0_42] : memref<12x18x4xf32, #tpu.memory_space<vmem>>, vector<10x16x4xf32>
    %52 = vector.shape_cast %51 : vector<10x16x4xf32> to vector<160x4xf32>
    %53 = arith.truncf %52 : vector<160x4xf32> to vector<160x4xbf16>
    %c3 = arith.constant 3 : index
    %c0_43 = arith.constant 0 : index
    %c0_44 = arith.constant 0 : index
    %54 = vector.load %arg3[%c3, %c0_43, %c0_44] : memref<9x4x4xbf16, #tpu.memory_space<vmem>>, vector<1x4x4xbf16>
    %55 = vector.shape_cast %54 : vector<1x4x4xbf16> to vector<4x4xbf16>
    %cst_45 = arith.constant dense<0.000000e+00> : vector<160x4xf32>
    %56 = tpu.matmul %53, %55, %cst_45 {dimension_numbers = #tpu.dot_dimension_numbers<[1], [0], [0], [1], [0, 0, 1, 1], [], []>} : vector<160x4xbf16>, vector<4x4xbf16>, vector<160x4xf32> -> vector<160x4xf32>
    %57 = arith.addf %50, %56 : vector<160x4xf32>
    %c1_46 = arith.constant 1 : index
    %c1_47 = arith.constant 1 : index
    %c0_48 = arith.constant 0 : index
    %58 = vector.load %arg9[%c1_46, %c1_47, %c0_48] : memref<12x18x4xf32, #tpu.memory_space<vmem>>, vector<10x16x4xf32>
    %59 = vector.shape_cast %58 : vector<10x16x4xf32> to vector<160x4xf32>
    %60 = arith.truncf %59 : vector<160x4xf32> to vector<160x4xbf16>
    %c4 = arith.constant 4 : index
    %c0_49 = arith.constant 0 : index
    %c0_50 = arith.constant 0 : index
    %61 = vector.load %arg3[%c4, %c0_49, %c0_50] : memref<9x4x4xbf16, #tpu.memory_space<vmem>>, vector<1x4x4xbf16>
    %62 = vector.shape_cast %61 : vector<1x4x4xbf16> to vector<4x4xbf16>
    %cst_51 = arith.constant dense<0.000000e+00> : vector<160x4xf32>
    %63 = tpu.matmul %60, %62, %cst_51 {dimension_numbers = #tpu.dot_dimension_numbers<[1], [0], [0], [1], [0, 0, 1, 1], [], []>} : vector<160x4xbf16>, vector<4x4xbf16>, vector<160x4xf32> -> vector<160x4xf32>
    %64 = arith.addf %57, %63 : vector<160x4xf32>
    %c1_52 = arith.constant 1 : index
    %c2_53 = arith.constant 2 : index
    %c0_54 = arith.constant 0 : index
    %65 = vector.load %arg9[%c1_52, %c2_53, %c0_54] : memref<12x18x4xf32, #tpu.memory_space<vmem>>, vector<10x16x4xf32>
    %66 = vector.shape_cast %65 : vector<10x16x4xf32> to vector<160x4xf32>
    %67 = arith.truncf %66 : vector<160x4xf32> to vector<160x4xbf16>
    %c5 = arith.constant 5 : index
    %c0_55 = arith.constant 0 : index
    %c0_56 = arith.constant 0 : index
    %68 = vector.load %arg3[%c5, %c0_55, %c0_56] : memref<9x4x4xbf16, #tpu.memory_space<vmem>>, vector<1x4x4xbf16>
    %69 = vector.shape_cast %68 : vector<1x4x4xbf16> to vector<4x4xbf16>
    %cst_57 = arith.constant dense<0.000000e+00> : vector<160x4xf32>
    %70 = tpu.matmul %67, %69, %cst_57 {dimension_numbers = #tpu.dot_dimension_numbers<[1], [0], [0], [1], [0, 0, 1, 1], [], []>} : vector<160x4xbf16>, vector<4x4xbf16>, vector<160x4xf32> -> vector<160x4xf32>
    %71 = arith.addf %64, %70 : vector<160x4xf32>
    %c2_58 = arith.constant 2 : index
    %c0_59 = arith.constant 0 : index
    %c0_60 = arith.constant 0 : index
    %72 = vector.load %arg9[%c2_58, %c0_59, %c0_60] : memref<12x18x4xf32, #tpu.memory_space<vmem>>, vector<10x16x4xf32>
    %73 = vector.shape_cast %72 : vector<10x16x4xf32> to vector<160x4xf32>
    %74 = arith.truncf %73 : vector<160x4xf32> to vector<160x4xbf16>
    %c6 = arith.constant 6 : index
    %c0_61 = arith.constant 0 : index
    %c0_62 = arith.constant 0 : index
    %75 = vector.load %arg3[%c6, %c0_61, %c0_62] : memref<9x4x4xbf16, #tpu.memory_space<vmem>>, vector<1x4x4xbf16>
    %76 = vector.shape_cast %75 : vector<1x4x4xbf16> to vector<4x4xbf16>
    %cst_63 = arith.constant dense<0.000000e+00> : vector<160x4xf32>
    %77 = tpu.matmul %74, %76, %cst_63 {dimension_numbers = #tpu.dot_dimension_numbers<[1], [0], [0], [1], [0, 0, 1, 1], [], []>} : vector<160x4xbf16>, vector<4x4xbf16>, vector<160x4xf32> -> vector<160x4xf32>
    %78 = arith.addf %71, %77 : vector<160x4xf32>
    %c2_64 = arith.constant 2 : index
    %c1_65 = arith.constant 1 : index
    %c0_66 = arith.constant 0 : index
    %79 = vector.load %arg9[%c2_64, %c1_65, %c0_66] : memref<12x18x4xf32, #tpu.memory_space<vmem>>, vector<10x16x4xf32>
    %80 = vector.shape_cast %79 : vector<10x16x4xf32> to vector<160x4xf32>
    %81 = arith.truncf %80 : vector<160x4xf32> to vector<160x4xbf16>
    %c7 = arith.constant 7 : index
    %c0_67 = arith.constant 0 : index
    %c0_68 = arith.constant 0 : index
    %82 = vector.load %arg3[%c7, %c0_67, %c0_68] : memref<9x4x4xbf16, #tpu.memory_space<vmem>>, vector<1x4x4xbf16>
    %83 = vector.shape_cast %82 : vector<1x4x4xbf16> to vector<4x4xbf16>
    %cst_69 = arith.constant dense<0.000000e+00> : vector<160x4xf32>
    %84 = tpu.matmul %81, %83, %cst_69 {dimension_numbers = #tpu.dot_dimension_numbers<[1], [0], [0], [1], [0, 0, 1, 1], [], []>} : vector<160x4xbf16>, vector<4x4xbf16>, vector<160x4xf32> -> vector<160x4xf32>
    %85 = arith.addf %78, %84 : vector<160x4xf32>
    %c2_70 = arith.constant 2 : index
    %c2_71 = arith.constant 2 : index
    %c0_72 = arith.constant 0 : index
    %86 = vector.load %arg9[%c2_70, %c2_71, %c0_72] : memref<12x18x4xf32, #tpu.memory_space<vmem>>, vector<10x16x4xf32>
    %87 = vector.shape_cast %86 : vector<10x16x4xf32> to vector<160x4xf32>
    %88 = arith.truncf %87 : vector<160x4xf32> to vector<160x4xbf16>
    %c8 = arith.constant 8 : index
    %c0_73 = arith.constant 0 : index
    %c0_74 = arith.constant 0 : index
    %89 = vector.load %arg3[%c8, %c0_73, %c0_74] : memref<9x4x4xbf16, #tpu.memory_space<vmem>>, vector<1x4x4xbf16>
    %90 = vector.shape_cast %89 : vector<1x4x4xbf16> to vector<4x4xbf16>
    %cst_75 = arith.constant dense<0.000000e+00> : vector<160x4xf32>
    %91 = tpu.matmul %88, %90, %cst_75 {dimension_numbers = #tpu.dot_dimension_numbers<[1], [0], [0], [1], [0, 0, 1, 1], [], []>} : vector<160x4xbf16>, vector<4x4xbf16>, vector<160x4xf32> -> vector<160x4xf32>
    %92 = arith.addf %85, %91 : vector<160x4xf32>
    %c0_76 = arith.constant 0 : index
    %c0_77 = arith.constant 0 : index
    %93 = vector.load %arg7[%c0_76, %c0_77] : memref<1x4xf32, #tpu.memory_space<vmem>>, vector<1x4xf32>
    %94 = vector.broadcast %93 : vector<1x4xf32> to vector<160x4xf32>
    %95 = arith.addf %92, %94 : vector<160x4xf32>
    %cst_78 = arith.constant 0.000000e+00 : f32
    %96 = vector.broadcast %cst_78 : f32 to vector<160x4xf32>
    %97 = arith.maximumf %95, %96 : vector<160x4xf32>
    %cst_79 = arith.constant 0.000000e+00 : f32
    %98 = vector.broadcast %cst_79 : f32 to vector<10x1x4xf32>
    %c0_80 = arith.constant 0 : index
    %c0_81 = arith.constant 0 : index
    %c0_82 = arith.constant 0 : index
    %99 = vector.load %arg10[%c0_80, %c0_81, %c0_82] : memref<10x18x4xf32, #tpu.memory_space<vmem>>, vector<10x1x4xf32>
    tpu.vector_store %arg10[%c0_80, %c0_81, %c0_82], %98 {strides = array<i32>} : memref<10x18x4xf32, #tpu.memory_space<vmem>>, vector<10x1x4xf32>,
    %c0_83 = arith.constant 0 : index
    %c17_84 = arith.constant 17 : index
    %c0_85 = arith.constant 0 : index
    %100 = vector.load %arg10[%c0_83, %c17_84, %c0_85] : memref<10x18x4xf32, #tpu.memory_space<vmem>>, vector<10x1x4xf32>
    tpu.vector_store %arg10[%c0_83, %c17_84, %c0_85], %98 {strides = array<i32>} : memref<10x18x4xf32, #tpu.memory_space<vmem>>, vector<10x1x4xf32>,
    %101 = vector.shape_cast %97 : vector<160x4xf32> to vector<10x16x4xf32>
    %c0_86 = arith.constant 0 : index
    %c1_87 = arith.constant 1 : index
    %c0_88 = arith.constant 0 : index
    %102 = vector.load %arg10[%c0_86, %c1_87, %c0_88] : memref<10x18x4xf32, #tpu.memory_space<vmem>>, vector<10x16x4xf32>
    tpu.vector_store %arg10[%c0_86, %c1_87, %c0_88], %101 {strides = array<i32>} : memref<10x18x4xf32, #tpu.memory_space<vmem>>, vector<10x16x4xf32>,
    %c0_i32_89 = arith.constant 0 : i32
    %103 = arith.cmpi eq, %arg1, %c0_i32_89 : i32
    %104 = arith.extui %103 : i1 to i32
    %c0_i32_90 = arith.constant 0 : i32
    %105 = arith.cmpi ne, %104, %c0_i32_90 : i32
    scf.if %105 {
      %cst_163 = arith.constant 0.000000e+00 : f32
      %178 = vector.broadcast %cst_163 : f32 to vector<1x18x4xf32>
      %c0_164 = arith.constant 0 : index
      %c0_165 = arith.constant 0 : index
      %c0_166 = arith.constant 0 : index
      %179 = vector.load %arg10[%c0_164, %c0_165, %c0_166] : memref<10x18x4xf32, #tpu.memory_space<vmem>>, vector<1x18x4xf32>
      tpu.vector_store %arg10[%c0_164, %c0_165, %c0_166], %178 {strides = array<i32>} : memref<10x18x4xf32, #tpu.memory_space<vmem>>, vector<1x18x4xf32>,
    } else {
    }
    %c1_i32_91 = arith.constant 1 : i32
    %106 = arith.cmpi eq, %arg1, %c1_i32_91 : i32
    %107 = arith.extui %106 : i1 to i32
    %c0_i32_92 = arith.constant 0 : i32
    %108 = arith.cmpi ne, %107, %c0_i32_92 : i32
    scf.if %108 {
      %cst_163 = arith.constant 0.000000e+00 : f32
      %178 = vector.broadcast %cst_163 : f32 to vector<1x18x4xf32>
      %c9 = arith.constant 9 : index
      %c0_164 = arith.constant 0 : index
      %c0_165 = arith.constant 0 : index
      %179 = vector.load %arg10[%c9, %c0_164, %c0_165] : memref<10x18x4xf32, #tpu.memory_space<vmem>>, vector<1x18x4xf32>
      tpu.vector_store %arg10[%c9, %c0_164, %c0_165], %178 {strides = array<i32>} : memref<10x18x4xf32, #tpu.memory_space<vmem>>, vector<1x18x4xf32>,
    } else {
    }
    %c0_93 = arith.constant 0 : index
    %c0_94 = arith.constant 0 : index
    %c0_95 = arith.constant 0 : index
    %109 = vector.load %arg10[%c0_93, %c0_94, %c0_95] : memref<10x18x4xf32, #tpu.memory_space<vmem>>, vector<8x16x4xf32>
    %110 = vector.shape_cast %109 : vector<8x16x4xf32> to vector<128x4xf32>
    %111 = arith.truncf %110 : vector<128x4xf32> to vector<128x4xbf16>
    %c0_96 = arith.constant 0 : index
    %c0_97 = arith.constant 0 : index
    %c0_98 = arith.constant 0 : index
    %112 = vector.load %arg4[%c0_96, %c0_97, %c0_98] : memref<9x4x4xbf16, #tpu.memory_space<vmem>>, vector<1x4x4xbf16>
    %113 = vector.shape_cast %112 : vector<1x4x4xbf16> to vector<4x4xbf16>
    %cst_99 = arith.constant dense<0.000000e+00> : vector<128x4xf32>
    %114 = tpu.matmul %111, %113, %cst_99 {dimension_numbers = #tpu.dot_dimension_numbers<[1], [0], [0], [1], [0, 0, 1, 1], [], []>} : vector<128x4xbf16>, vector<4x4xbf16>, vector<128x4xf32> -> vector<128x4xf32>
    %c0_100 = arith.constant 0 : index
    %c1_101 = arith.constant 1 : index
    %c0_102 = arith.constant 0 : index
    %115 = vector.load %arg10[%c0_100, %c1_101, %c0_102] : memref<10x18x4xf32, #tpu.memory_space<vmem>>, vector<8x16x4xf32>
    %116 = vector.shape_cast %115 : vector<8x16x4xf32> to vector<128x4xf32>
    %117 = arith.truncf %116 : vector<128x4xf32> to vector<128x4xbf16>
    %c1_103 = arith.constant 1 : index
    %c0_104 = arith.constant 0 : index
    %c0_105 = arith.constant 0 : index
    %118 = vector.load %arg4[%c1_103, %c0_104, %c0_105] : memref<9x4x4xbf16, #tpu.memory_space<vmem>>, vector<1x4x4xbf16>
    %119 = vector.shape_cast %118 : vector<1x4x4xbf16> to vector<4x4xbf16>
    %cst_106 = arith.constant dense<0.000000e+00> : vector<128x4xf32>
    %120 = tpu.matmul %117, %119, %cst_106 {dimension_numbers = #tpu.dot_dimension_numbers<[1], [0], [0], [1], [0, 0, 1, 1], [], []>} : vector<128x4xbf16>, vector<4x4xbf16>, vector<128x4xf32> -> vector<128x4xf32>
    %121 = arith.addf %114, %120 : vector<128x4xf32>
    %c0_107 = arith.constant 0 : index
    %c2_108 = arith.constant 2 : index
    %c0_109 = arith.constant 0 : index
    %122 = vector.load %arg10[%c0_107, %c2_108, %c0_109] : memref<10x18x4xf32, #tpu.memory_space<vmem>>, vector<8x16x4xf32>
    %123 = vector.shape_cast %122 : vector<8x16x4xf32> to vector<128x4xf32>
    %124 = arith.truncf %123 : vector<128x4xf32> to vector<128x4xbf16>
    %c2_110 = arith.constant 2 : index
    %c0_111 = arith.constant 0 : index
    %c0_112 = arith.constant 0 : index
    %125 = vector.load %arg4[%c2_110, %c0_111, %c0_112] : memref<9x4x4xbf16, #tpu.memory_space<vmem>>, vector<1x4x4xbf16>
    %126 = vector.shape_cast %125 : vector<1x4x4xbf16> to vector<4x4xbf16>
    %cst_113 = arith.constant dense<0.000000e+00> : vector<128x4xf32>
    %127 = tpu.matmul %124, %126, %cst_113 {dimension_numbers = #tpu.dot_dimension_numbers<[1], [0], [0], [1], [0, 0, 1, 1], [], []>} : vector<128x4xbf16>, vector<4x4xbf16>, vector<128x4xf32> -> vector<128x4xf32>
    %128 = arith.addf %121, %127 : vector<128x4xf32>
    %c1_114 = arith.constant 1 : index
    %c0_115 = arith.constant 0 : index
    %c0_116 = arith.constant 0 : index
    %129 = vector.load %arg10[%c1_114, %c0_115, %c0_116] : memref<10x18x4xf32, #tpu.memory_space<vmem>>, vector<8x16x4xf32>
    %130 = vector.shape_cast %129 : vector<8x16x4xf32> to vector<128x4xf32>
    %131 = arith.truncf %130 : vector<128x4xf32> to vector<128x4xbf16>
    %c3_117 = arith.constant 3 : index
    %c0_118 = arith.constant 0 : index
    %c0_119 = arith.constant 0 : index
    %132 = vector.load %arg4[%c3_117, %c0_118, %c0_119] : memref<9x4x4xbf16, #tpu.memory_space<vmem>>, vector<1x4x4xbf16>
    %133 = vector.shape_cast %132 : vector<1x4x4xbf16> to vector<4x4xbf16>
    %cst_120 = arith.constant dense<0.000000e+00> : vector<128x4xf32>
    %134 = tpu.matmul %131, %133, %cst_120 {dimension_numbers = #tpu.dot_dimension_numbers<[1], [0], [0], [1], [0, 0, 1, 1], [], []>} : vector<128x4xbf16>, vector<4x4xbf16>, vector<128x4xf32> -> vector<128x4xf32>
    %135 = arith.addf %128, %134 : vector<128x4xf32>
    %c1_121 = arith.constant 1 : index
    %c1_122 = arith.constant 1 : index
    %c0_123 = arith.constant 0 : index
    %136 = vector.load %arg10[%c1_121, %c1_122, %c0_123] : memref<10x18x4xf32, #tpu.memory_space<vmem>>, vector<8x16x4xf32>
    %137 = vector.shape_cast %136 : vector<8x16x4xf32> to vector<128x4xf32>
    %138 = arith.truncf %137 : vector<128x4xf32> to vector<128x4xbf16>
    %c4_124 = arith.constant 4 : index
    %c0_125 = arith.constant 0 : index
    %c0_126 = arith.constant 0 : index
    %139 = vector.load %arg4[%c4_124, %c0_125, %c0_126] : memref<9x4x4xbf16, #tpu.memory_space<vmem>>, vector<1x4x4xbf16>
    %140 = vector.shape_cast %139 : vector<1x4x4xbf16> to vector<4x4xbf16>
    %cst_127 = arith.constant dense<0.000000e+00> : vector<128x4xf32>
    %141 = tpu.matmul %138, %140, %cst_127 {dimension_numbers = #tpu.dot_dimension_numbers<[1], [0], [0], [1], [0, 0, 1, 1], [], []>} : vector<128x4xbf16>, vector<4x4xbf16>, vector<128x4xf32> -> vector<128x4xf32>
    %142 = arith.addf %135, %141 : vector<128x4xf32>
    %c1_128 = arith.constant 1 : index
    %c2_129 = arith.constant 2 : index
    %c0_130 = arith.constant 0 : index
    %143 = vector.load %arg10[%c1_128, %c2_129, %c0_130] : memref<10x18x4xf32, #tpu.memory_space<vmem>>, vector<8x16x4xf32>
    %144 = vector.shape_cast %143 : vector<8x16x4xf32> to vector<128x4xf32>
    %145 = arith.truncf %144 : vector<128x4xf32> to vector<128x4xbf16>
    %c5_131 = arith.constant 5 : index
    %c0_132 = arith.constant 0 : index
    %c0_133 = arith.constant 0 : index
    %146 = vector.load %arg4[%c5_131, %c0_132, %c0_133] : memref<9x4x4xbf16, #tpu.memory_space<vmem>>, vector<1x4x4xbf16>
    %147 = vector.shape_cast %146 : vector<1x4x4xbf16> to vector<4x4xbf16>
    %cst_134 = arith.constant dense<0.000000e+00> : vector<128x4xf32>
    %148 = tpu.matmul %145, %147, %cst_134 {dimension_numbers = #tpu.dot_dimension_numbers<[1], [0], [0], [1], [0, 0, 1, 1], [], []>} : vector<128x4xbf16>, vector<4x4xbf16>, vector<128x4xf32> -> vector<128x4xf32>
    %149 = arith.addf %142, %148 : vector<128x4xf32>
    %c2_135 = arith.constant 2 : index
    %c0_136 = arith.constant 0 : index
    %c0_137 = arith.constant 0 : index
    %150 = vector.load %arg10[%c2_135, %c0_136, %c0_137] : memref<10x18x4xf32, #tpu.memory_space<vmem>>, vector<8x16x4xf32>
    %151 = vector.shape_cast %150 : vector<8x16x4xf32> to vector<128x4xf32>
    %152 = arith.truncf %151 : vector<128x4xf32> to vector<128x4xbf16>
    %c6_138 = arith.constant 6 : index
    %c0_139 = arith.constant 0 : index
    %c0_140 = arith.constant 0 : index
    %153 = vector.load %arg4[%c6_138, %c0_139, %c0_140] : memref<9x4x4xbf16, #tpu.memory_space<vmem>>, vector<1x4x4xbf16>
    %154 = vector.shape_cast %153 : vector<1x4x4xbf16> to vector<4x4xbf16>
    %cst_141 = arith.constant dense<0.000000e+00> : vector<128x4xf32>
    %155 = tpu.matmul %152, %154, %cst_141 {dimension_numbers = #tpu.dot_dimension_numbers<[1], [0], [0], [1], [0, 0, 1, 1], [], []>} : vector<128x4xbf16>, vector<4x4xbf16>, vector<128x4xf32> -> vector<128x4xf32>
    %156 = arith.addf %149, %155 : vector<128x4xf32>
    %c2_142 = arith.constant 2 : index
    %c1_143 = arith.constant 1 : index
    %c0_144 = arith.constant 0 : index
    %157 = vector.load %arg10[%c2_142, %c1_143, %c0_144] : memref<10x18x4xf32, #tpu.memory_space<vmem>>, vector<8x16x4xf32>
    %158 = vector.shape_cast %157 : vector<8x16x4xf32> to vector<128x4xf32>
    %159 = arith.truncf %158 : vector<128x4xf32> to vector<128x4xbf16>
    %c7_145 = arith.constant 7 : index
    %c0_146 = arith.constant 0 : index
    %c0_147 = arith.constant 0 : index
    %160 = vector.load %arg4[%c7_145, %c0_146, %c0_147] : memref<9x4x4xbf16, #tpu.memory_space<vmem>>, vector<1x4x4xbf16>
    %161 = vector.shape_cast %160 : vector<1x4x4xbf16> to vector<4x4xbf16>
    %cst_148 = arith.constant dense<0.000000e+00> : vector<128x4xf32>
    %162 = tpu.matmul %159, %161, %cst_148 {dimension_numbers = #tpu.dot_dimension_numbers<[1], [0], [0], [1], [0, 0, 1, 1], [], []>} : vector<128x4xbf16>, vector<4x4xbf16>, vector<128x4xf32> -> vector<128x4xf32>
    %163 = arith.addf %156, %162 : vector<128x4xf32>
    %c2_149 = arith.constant 2 : index
    %c2_150 = arith.constant 2 : index
    %c0_151 = arith.constant 0 : index
    %164 = vector.load %arg10[%c2_149, %c2_150, %c0_151] : memref<10x18x4xf32, #tpu.memory_space<vmem>>, vector<8x16x4xf32>
    %165 = vector.shape_cast %164 : vector<8x16x4xf32> to vector<128x4xf32>
    %166 = arith.truncf %165 : vector<128x4xf32> to vector<128x4xbf16>
    %c8_152 = arith.constant 8 : index
    %c0_153 = arith.constant 0 : index
    %c0_154 = arith.constant 0 : index
    %167 = vector.load %arg4[%c8_152, %c0_153, %c0_154] : memref<9x4x4xbf16, #tpu.memory_space<vmem>>, vector<1x4x4xbf16>
    %168 = vector.shape_cast %167 : vector<1x4x4xbf16> to vector<4x4xbf16>
    %cst_155 = arith.constant dense<0.000000e+00> : vector<128x4xf32>
    %169 = tpu.matmul %166, %168, %cst_155 {dimension_numbers = #tpu.dot_dimension_numbers<[1], [0], [0], [1], [0, 0, 1, 1], [], []>} : vector<128x4xbf16>, vector<4x4xbf16>, vector<128x4xf32> -> vector<128x4xf32>
    %170 = arith.addf %163, %169 : vector<128x4xf32>
    %c0_156 = arith.constant 0 : index
    %171 = arith.index_cast %1 : i32 to index
    %c0_157 = arith.constant 0 : index
    %c0_158 = arith.constant 0 : index
    %172 = vector.load %arg2[%c0_156, %171, %c0_157, %c0_158] : memref<1x16x16x4xf32, #tpu.memory_space<vmem>>, vector<1x8x16x4xf32>
    %173 = vector.shape_cast %172 : vector<1x8x16x4xf32> to vector<8x16x4xf32>
    %174 = vector.shape_cast %173 : vector<8x16x4xf32> to vector<128x4xf32>
    %175 = arith.addf %170, %174 : vector<128x4xf32>
    %176 = vector.shape_cast %175 : vector<128x4xf32> to vector<1x8x16x4xf32>
    %c0_159 = arith.constant 0 : index
    %c0_160 = arith.constant 0 : index
    %c0_161 = arith.constant 0 : index
    %c0_162 = arith.constant 0 : index
    %177 = vector.load %arg8[%c0_159, %c0_160, %c0_161, %c0_162] : memref<1x8x16x4xf32, #tpu.memory_space<vmem>>, vector<1x8x16x4xf32>
    tpu.vector_store %arg8[%c0_159, %c0_160, %c0_161, %c0_162], %176 {strides = array<i32>} : memref<1x8x16x4xf32, #tpu.memory_space<vmem>>, vector<1x8x16x4xf32>,
    return
  }
  func.func @transform_0(%arg0: i32, %arg1: i32) -> (i32, i32, i32, i32) {
    %c0_i32 = arith.constant 0 : i32
    %c0_i32_0 = arith.constant 0 : i32
    %c0_i32_1 = arith.constant 0 : i32
    %c0_i32_2 = arith.constant 0 : i32
    return %arg0, %c0_i32, %c0_i32_0, %c0_i32_1 : i32, i32, i32, i32
  }
  func.func @transform_1(%arg0: i32, %arg1: i32) -> (i32, i32, i32) {
    %c0_i32 = arith.constant 0 : i32
    %c0_i32_0 = arith.constant 0 : i32
    %c0_i32_1 = arith.constant 0 : i32
    %c0_i32_2 = arith.constant 0 : i32
    return %c0_i32, %c0_i32_0, %c0_i32_1 : i32, i32, i32
  }
  func.func @transform_2(%arg0: i32, %arg1: i32) -> (i32, i32, i32) {
    %c0_i32 = arith.constant 0 : i32
    %c0_i32_0 = arith.constant 0 : i32
    %c0_i32_1 = arith.constant 0 : i32
    %c0_i32_2 = arith.constant 0 : i32
    return %c0_i32, %c0_i32_0, %c0_i32_1 : i32, i32, i32
  }
  func.func @transform_3(%arg0: i32, %arg1: i32) -> (i32, i32) {
    %c0_i32 = arith.constant 0 : i32
    %c0_i32_0 = arith.constant 0 : i32
    %c0_i32_1 = arith.constant 0 : i32
    return %c0_i32, %c0_i32_0 : i32, i32
  }
  func.func @transform_4(%arg0: i32, %arg1: i32) -> (i32, i32) {
    %c0_i32 = arith.constant 0 : i32
    %c0_i32_0 = arith.constant 0 : i32
    %c0_i32_1 = arith.constant 0 : i32
    return %c0_i32, %c0_i32_0 : i32, i32
  }
  func.func @transform_5(%arg0: i32, %arg1: i32) -> (i32, i32) {
    %c0_i32 = arith.constant 0 : i32
    %c0_i32_0 = arith.constant 0 : i32
    %c0_i32_1 = arith.constant 0 : i32
    return %c0_i32, %c0_i32_0 : i32, i32
  }
  func.func @transform_6(%arg0: i32, %arg1: i32) -> (i32, i32, i32, i32) {
    %c0_i32 = arith.constant 0 : i32
    %c0_i32_0 = arith.constant 0 : i32
    %c0_i32_1 = arith.constant 0 : i32
    return %arg0, %arg1, %c0_i32, %c0_i32_0 : i32, i32, i32, i32
  }
}

</mosaic_0001>

<bundles_post_ra>
// kernel: tpu_custom_call.1
= control target key start
LH: loop header
LB: loop body
LE: loop exit
PB: predicated region body
PF: predicated region fallthrough
CT: control target
= control target key end

     0   :  { %s5118_s21 = smov 0   ;;  %s5120_s22 = smov 0   ;;  %s6005_s0 = inlined_call_operand.vmem [shape: f32[2,16,16,4], index: 0, kind: input, shape index: {}]   ;;  %s6006_s1 = inlined_call_operand.vmem [shape: bf16[9,4,4], index: 1, kind: input, shape index: {}]   ;;  %s6007_s2 = inlined_call_operand.vmem [shape: bf16[9,4,4], index: 2, kind: input, shape index: {}]   ;;  %s6008_s3 = inlined_call_operand.vmem [shape: f32[1,4], index: 3, kind: input, shape index: {}]   ;;  %s6009_s4 = inlined_call_operand.vmem [shape: f32[1,4], index: 4, kind: input, shape index: {}]   ;;  %s6010_s5 = inlined_call_operand.vmem [shape: f32[1,4], index: 5, kind: input, shape index: {}]   ;;  %s6011_s6 = inlined_call_operand.vmem [shape: f32[2,16,16,4], index: 6, kind: output, shape index: {}]  }
   0x1   :  { %s5122_s23 = smov 0   ;;  %s5124_s24 = smov 0  }
   0x2   :  { %s5126_s25 = smov 0  }
   0x3 LB: > { %s25_s26 = sadd.s32 1, %s5068_s23  ;;  %s28_s27 = sadd.s32 1, %s5072_s24  ;;  %s5076_s25 = sphi %s5126_s25, %s16_s25   ;;  %s5072_s24 = sphi %s5124_s24, %s6015_s24   ;;  %s5068_s23 = sphi %s5122_s23, %s6014_s23   ;;  %s5064_s22 = sphi %s5120_s22, %s6013_s22   ;;  %s5060_s21 = sphi %s5118_s21, %s6012_s21  }
   0x4   : > { %p26_p0 = scmp.ge.s32.totalorder %s25_s26, 2  ;;  %p3938_p1 = scmp.ge.s32.totalorder %s5076_s25, 1 }
   0x5   : > { %p226_p2 = scmp.lt.s32.totalorder %s5076_s25, 5 }
   0x6   : > { %s6017_s26 = smov (%p26_p0, %s25_s26), 0  ;;  %s6019_s27 = smov (!%p26_p0, %s28_s27), %s5072_s24 }
   0x7   : > { %p227_p3 = pnand %p3938_p1, %p226_p2  ;;  %p30_p4 = scmp.ge.s32.totalorder %s6019_s27, 2 }
   0x8   : > { %vm281_vm0 = vcmask (!%p227_p3), 24576   ;;  %p261_p5 = scmp.lt.s32.totalorder (!%p227_p3), %s5064_s22, 1  ;;  %s5154_s28 = sshll.u32 (!%p227_p3), %s5060_s21, 3  ;;  %v5078_v0 = vmov (!%p227_p3), 0.0   ;;  %v5218_v1 = vld [vmem:[%s6008_s3] ss:$0 sm:$0xff] (!%p227_p3) }
   0x9   : > { %s6021_s27 = smov (%p30_p4, %s6019_s27), 0  ;;  %230 = sbr.rel (%p227_p3) target bundleno = 1120 (0x460), region = 44 }
   0xa   : > { %282 = vst.msk [vmem:[#allocation2] sm:$0x1] (!%p227_p3), %vm281_vm0, %v5078_v0  ;;  %283 = vst.msk [vmem:[#allocation2 + $0x18] sm:$0x1] (!%p227_p3), %vm281_vm0, %v5078_v0  ;;  %p269_p6 = scmp.lt.s32.totalorder (!%p227_p3), %s5154_s28, 15  ;;  %s4145_s29 = sshll.u32 (!%p227_p3), %s5060_s21, 7 }
   0xb   : > { %284 = vst.msk [vmem:[#allocation2 + $0x30] sm:$0x1] (!%p227_p3), %vm281_vm0, %v5078_v0  ;;  %285 = vst.msk [vmem:[#allocation2 + $0x48] sm:$0x1] (!%p227_p3), %vm281_vm0, %v5078_v0  ;;  %v5223_v2 = vld [vmem:[%s6009_s4] ss:$0 sm:$0xff] (!%p227_p3) }
   0xc   : > { %286 = vst.msk [vmem:[#allocation2 + $0x60] sm:$0x1] (!%p227_p3), %vm281_vm0, %v5078_v0  ;;  %287 = vst.msk [vmem:[#allocation2 + $0x78] sm:$0x1] (!%p227_p3), %vm281_vm0, %v5078_v0  ;;  %vm385_vm1 = vcmask (!%p227_p3), 31744   ;;  %p3949_p7 = scmp.le.s32.totalorder (!%p227_p3), %s5060_s21, 0 }
   0xd   : > { %288 = vst.msk [vmem:[#allocation2 + $0x90] sm:$0x1] (!%p227_p3), %vm281_vm0, %v5078_v0  ;;  %289 = vst.msk [vmem:[#allocation2 + $0xa8] sm:$0x1] (!%p227_p3), %vm281_vm0, %v5078_v0 }
   0xe   : > { %290 = vst.msk [vmem:[#allocation2 + $0xc0] sm:$0x1] (!%p227_p3), %vm281_vm0, %v5078_v0  ;;  %291 = vst.msk [vmem:[#allocation2 + $0xd8] sm:$0x1] (!%p227_p3), %vm281_vm0, %v5078_v0 }
   0xf   : > { %292 = vst.msk [vmem:[#allocation2 + $0xf0] sm:$0x1] (!%p227_p3), %vm281_vm0, %v5078_v0  ;;  %293 = vst.msk [vmem:[#allocation2 + $0x108] sm:$0x1] (!%p227_p3), %vm281_vm0, %v5078_v0 }
  0x10   : > { %294 = vst.msk [vmem:[#allocation2 + $0x11] sm:$0x1] %vm281_vm0, %v5078_v0  ;;  %295 = vst.msk [vmem:[#allocation2 + $0x29] sm:$0x1] %vm281_vm0, %v5078_v0  ;;  %s6023_s22 = smov (!%p261_p5, %s5064_s22), 1 }
  0x11   : > { %296 = vst.msk [vmem:[#allocation2 + $0x41] sm:$0x1] %vm281_vm0, %v5078_v0  ;;  %297 = vst.msk [vmem:[#allocation2 + $0x59] sm:$0x1] %vm281_vm0, %v5078_v0  ;;  %s270_s30 = scalar_select %p269_p6, %s5154_s28, 15 }
  0x12   : > { %298 = vst.msk [vmem:[#allocation2 + $0x71] sm:$0x1] %vm281_vm0, %v5078_v0  ;;  %299 = vst.msk [vmem:[#allocation2 + $0x89] sm:$0x1] %vm281_vm0, %v5078_v0  ;;  %s4144_s7 = sshll.u32 %s6023_s22, 8  ;;  %s3943_s8 = sshll.u32 %s6023_s22, 5 }
  0x13   : > { %300 = vst.msk [vmem:[#allocation2 + $0xa1] sm:$0x1] %vm281_vm0, %v5078_v0  ;;  %301 = vst.msk [vmem:[#allocation2 + $0xb9] sm:$0x1] %vm281_vm0, %v5078_v0  ;;  %s5213_s11 = scalar_lea.vmem %s6005_s0, %s4144_s7  ;;  %s3942_s12 = sshll.u32 %s270_s30, 1 }
  0x14   : > { %302 = vst.msk [vmem:[#allocation2 + $0xd1] sm:$0x1] %vm281_vm0, %v5078_v0  ;;  %303 = vst.msk [vmem:[#allocation2 + $0xe9] sm:$0x1] %vm281_vm0, %v5078_v0  ;;  %s273_s15 = sadd.s32 %s3943_s8, %s3942_s12  ;;  %s5226_s18 = scalar_lea.vmem %s5213_s11, %s4145_s29 }
  0x15   : > { %304 = vst.msk [vmem:[#allocation2 + $0x101] sm:$0x1] %vm281_vm0, %v5078_v0  ;;  %305 = vst.msk [vmem:[#allocation2 + $0x119] sm:$0x1] %vm281_vm0, %v5078_v0  ;;  %s3944_s19 = sshll.u32 %s273_s15, 3  ;;  %v308_v3 = vld [vmem:[%s5226_s18] sm:$0xff] }
  0x16   : > { %v309_v4 = vld [vmem:[%s5226_s18 + $0x8] sm:$0xff]  ;;  %v310_v5 = vld [vmem:[%s5226_s18 + $0x10] sm:$0xff]  ;;  %s5234_s30 = scalar_lea.vmem %s6011_s6, %s3944_s19  ;;  %v330_v6 = vmul.f32 %v5218_v1, %v308_v3  ;;  %v311_v9 = vld [vmem:[%s5226_s18 + $0x18] sm:$0xff]  ;;  %s3950_s29 = sadd.s32 (!%p3949_p7), 4294967294, %s5154_s28 }
  0x17   : > { %v331_v7 = vmul.f32 %v5218_v1, %v309_v4  ;;  %v332_v8 = vmul.f32 %v5218_v1, %v310_v5  ;;  %v312_v10 = vld [vmem:[%s5226_s18 + $0x20] sm:$0xff]  ;;  %v313_v11 = vld [vmem:[%s5226_s18 + $0x28] sm:$0xff]  ;;  %v333_v12 = vmul.f32 %v5218_v1, %v311_v9  ;;  %v314_v15 = vld [vmem:[%s5226_s18 + $0x30] sm:$0xff]  ;;  %s3951_s7 = sshll.u32 (!%p3949_p7), %s3950_s29, 4 }
  0x18   : > { %v334_v13 = vmul.f32 %v5218_v1, %v312_v10  ;;  %v335_v14 = vmul.f32 %v5218_v1, %v313_v11  ;;  %v315_v16 = vld [vmem:[%s5226_s18 + $0x38] sm:$0xff]  ;;  %v352_v17 = vadd.f32 %v5223_v2, %v330_v6  ;;  %v336_v20 = vmul.f32 %v5218_v1, %v314_v15  ;;  %v316_v25 = vld [vmem:[%s5226_s18 + $0x40] sm:$0xff]  ;;  %v317_v26 = vld [vmem:[%s5226_s18 + $0x48] sm:$0xff]  ;;  %s408_s8 = scalar_lea.vmem (!%p3949_p7), %s5213_s11, %s3951_s7 }
  0x19   : > { %v353_v18 = vadd.f32 %v5223_v2, %v331_v7  ;;  %v354_v19 = vadd.f32 %v5223_v2, %v332_v8  ;;  %v355_v21 = vadd.f32 %v5223_v2, %v333_v12  ;;  %v337_v24 = vmul.f32 %v5218_v1, %v315_v16  ;;  %v318_v27 = vld [vmem:[%s5226_s18 + $0x50] sm:$0xff]  ;;  %v319_v32 = vld [vmem:[%s5226_s18 + $0x58] sm:$0xff]  ;;  %v320_v33 = vld [vmem:[%s5226_s18 + $0x60] sm:$0xff] }
  0x1a   : > { %v356_v22 = vadd.f32 %v5223_v2, %v334_v13  ;;  %v357_v23 = vadd.f32 %v5223_v2, %v335_v14  ;;  %v368_v28 = vmax.f32 %v352_v17, 0.0  ;;  %v358_v31 = vadd.f32 %v5223_v2, %v336_v20  ;;  %v321_v34 = vld [vmem:[%s5226_s18 + $0x68] sm:$0xff]  ;;  %v322_v39 = vld [vmem:[%s5226_s18 + $0x70] sm:$0xff]  ;;  %v323_v44 = vld [vmem:[%s5226_s18 + $0x78] sm:$0xff] }
  0x1b   : > { %v369_v29 = vmax.f32 %v353_v18, 0.0  ;;  %v370_v30 = vmax.f32 %v354_v19, 0.0  ;;  %v371_v35 = vmax.f32 %v355_v21, 0.0  ;;  %v359_v38 = vadd.f32 %v5223_v2, %v337_v24  ;;  %v409_v6 = vld [vmem:[%s408_s8] sm:$0xff] (!%p3949_p7)  ;;  %v410_v7 = vld [vmem:[%s408_s8 + $0x8] sm:$0xff] (!%p3949_p7)  ;;  %v411_v8 = vld [vmem:[%s408_s8 + $0x10] sm:$0xff] (!%p3949_p7) }
  0x1c   : > { %v372_v36 = vmax.f32 %v356_v22, 0.0  ;;  %v373_v37 = vmax.f32 %v357_v23, 0.0  ;;  %386 = vst.msk [vmem:[#allocation2 + $0x31] sm:$0xff] %vm385_vm1, %v368_v28  ;;  %v374_v40 = vmax.f32 %v358_v31, 0.0  ;;  %v338_v41 = vmul.f32 %v5218_v1, %v316_v25  ;;  %v412_v12 = vld [vmem:[%s408_s8 + $0x18] sm:$0xff] (!%p3949_p7) }
  0x1d   : > { %387 = vst.msk [vmem:[#allocation2 + $0x39] sm:$0xff] %vm385_vm1, %v369_v29  ;;  %388 = vst.msk [vmem:[#allocation2 + $0x49] sm:$0xff] %vm385_vm1, %v370_v30  ;;  %v339_v42 = vmul.f32 %v5218_v1, %v317_v26  ;;  %v340_v43 = vmul.f32 %v5218_v1, %v318_v27  ;;  %v375_v45 = vmax.f32 %v359_v38, 0.0  ;;  %v341_v46 = vmul.f32 %v5218_v1, %v319_v32 }
  0x1e   : > { %389 = vst.msk [vmem:[#allocation2 + $0x51] sm:$0xff] %vm385_vm1, %v371_v35  ;;  %390 = vst.msk [vmem:[#allocation2 + $0x61] sm:$0xff] %vm385_vm1, %v372_v36  ;;  %v342_v47 = vmul.f32 %v5218_v1, %v320_v33  ;;  %v343_v48 = vmul.f32 %v5218_v1, %v321_v34  ;;  %v360_v49 = vadd.f32 %v5223_v2, %v338_v41 }
  0x1f   : > { %391 = vst.msk [vmem:[#allocation2 + $0x69] sm:$0xff] %vm385_vm1, %v373_v37  ;;  %392 = vst.msk [vmem:[#allocation2 + $0x79] sm:$0xff] %vm385_vm1, %v374_v40  ;;  %v361_v50 = vadd.f32 %v5223_v2, %v339_v42  ;;  %v362_v51 = vadd.f32 %v5223_v2, %v340_v43  ;;  %v344_v52 = vmul.f32 %v5218_v1, %v322_v39 }
  0x20   : > { %393 = vst.msk [vmem:[#allocation2 + $0x81] sm:$0xff] %vm385_vm1, %v375_v45  ;;  %v363_v53 = vadd.f32 %v5223_v2, %v341_v46  ;;  %v364_v54 = vadd.f32 %v5223_v2, %v342_v47  ;;  %v365_v55 = vadd.f32 %v5223_v2, %v343_v48  ;;  %v345_v56 = vmul.f32 %v5218_v1, %v323_v44  ;;  %405 = sbr.rel (%p3949_p7) target bundleno = 43 (0x2b), region = 48 }
  0x21   : > { %v376_v57 = vmax.f32 %v360_v49, 0.0  ;;  %v377_v58 = vmax.f32 %v361_v50, 0.0  ;;  %v378_v59 = vmax.f32 %v362_v51, 0.0  ;;  %v366_v60 = vadd.f32 %v5223_v2, %v344_v52 }
  0x22   : > { %v379_v61 = vmax.f32 %v363_v53, 0.0  ;;  %v380_v62 = vmax.f32 %v364_v54, 0.0  ;;  %v381_v63 = vmax.f32 %v365_v55, 0.0  ;;  %v367_v3 = vadd.f32 %v5223_v2, %v345_v56 }
  0x23   : > { %394 = vst.msk [vmem:[#allocation2 + $0x91] sm:$0xff] %vm385_vm1, %v376_v57  ;;  %395 = vst.msk [vmem:[#allocation2 + $0x99] sm:$0xff] %vm385_vm1, %v377_v58  ;;  %v382_v4 = vmax.f32 %v366_v60, 0.0  ;;  %v413_v9 = vmul.f32 (!%p3949_p7), %v5218_v1, %v409_v6  ;;  %v414_v10 = vmul.f32 (!%p3949_p7), %v5218_v1, %v410_v7  ;;  %v415_v11 = vmul.f32 (!%p3949_p7), %v5218_v1, %v411_v8 }
  0x24   : > { %396 = vst.msk [vmem:[#allocation2 + $0xa9] sm:$0xff] %vm385_vm1, %v378_v59  ;;  %397 = vst.msk [vmem:[#allocation2 + $0xb1] sm:$0xff] %vm385_vm1, %v379_v61  ;;  %v383_v5 = vmax.f32 %v367_v3, 0.0  ;;  %v416_v13 = vmul.f32 (!%p3949_p7), %v5218_v1, %v412_v12 }
  0x25   : > { %398 = vst.msk [vmem:[#allocation2 + $0xc1] sm:$0xff] %vm385_vm1, %v380_v62  ;;  %399 = vst.msk [vmem:[#allocation2 + $0xc9] sm:$0xff] %vm385_vm1, %v381_v63  ;;  %v417_v14 = vadd.f32 (!%p3949_p7), %v5223_v2, %v413_v9  ;;  %v418_v15 = vadd.f32 (!%p3949_p7), %v5223_v2, %v414_v10  ;;  %v419_v16 = vadd.f32 (!%p3949_p7), %v5223_v2, %v415_v11 }
  0x26   : > { %400 = vst.msk [vmem:[#allocation2 + $0xd9] sm:$0xff] %vm385_vm1, %v382_v4  ;;  %401 = vst.msk [vmem:[#allocation2 + $0xe1] sm:$0xff] %vm385_vm1, %v383_v5  ;;  %v420_v17 = vadd.f32 (!%p3949_p7), %v5223_v2, %v416_v13 }
  0x27   : > { %v421_v18 = vmax.f32 %v417_v14, 0.0  ;;  %v422_v19 = vmax.f32 %v418_v15, 0.0  ;;  %v423_v20 = vmax.f32 %v419_v16, 0.0 }
  0x28   : > { %v424_v21 = vmax.f32 %v420_v17, 0.0 }
  0x29   : > { %425 = vst.msk [vmem:[#allocation2 + $0x1] sm:$0xff] %vm385_vm1, %v421_v18  ;;  %426 = vst.msk [vmem:[#allocation2 + $0x9] sm:$0xff] %vm385_vm1, %v422_v19 }
  0x2a   : > { %427 = vst.msk [vmem:[#allocation2 + $0x19] sm:$0xff] %vm385_vm1, %v423_v20  ;;  %428 = vst.msk [vmem:[#allocation2 + $0x21] sm:$0xff] %vm385_vm1, %v424_v21 }
  0x2b PF: > { %p3952_p8 = scmp.ne.s32.totalorder %s5060_s21, 0 }
  0x2c   : > { %vm435_vm2 = vcmask (!%p3952_p8), 25600   ;;  %v5079_v22 = vmov (!%p3952_p8), 0.0  }
  0x2d   : > { %432 = sbr.rel (%p3952_p8) target bundleno = 52 (0x34), region = 52  ;;  %433 = vst.msk [vmem:[#allocation2] sm:$0xff] (!%p3952_p8), %vm385_vm1, %v5079_v22  ;;  %434 = vst.msk [vmem:[#allocation2 + $0x8] sm:$0xff] (!%p3952_p8), %vm385_vm1, %v5079_v22 }
  0x2e   : > { %437 = vst.msk [vmem:[#allocation2 + $0x18] sm:$0xff] (!%p3952_p8), %vm385_vm1, %v5079_v22  ;;  %438 = vst.msk [vmem:[#allocation2 + $0x20] sm:$0xff] (!%p3952_p8), %vm385_vm1, %v5079_v22 }
  0x2f   : > { %436 = vst.msk [vmem:[#allocation2 + $0x10] sm:$0x3] (!%p3952_p8), %vm435_vm2, %v5079_v22  ;;  %439 = vst.msk [vmem:[#allocation2 + $0x28] sm:$0x3] (!%p3952_p8), %vm435_vm2, %v5079_v22 }
  0x34 PF: > { %p3953_p9 = scmp.ge.s32.totalorder %s5060_s21, 1 }
  0x35   : > { %v3956_v23 = vld [vmem:[%s5226_s18 + $0x80] sm:$0xff] (!%p3953_p9)  ;;  %v3957_v24 = vld [vmem:[%s5226_s18 + $0x88] sm:$0xff] (!%p3953_p9)  ;;  %v3958_v25 = vld [vmem:[%s5226_s18 + $0x90] sm:$0xff] (!%p3953_p9) }
  0x36   : > { %443 = sbr.rel (%p3953_p9) target bundleno = 62 (0x3e), region = 56  ;;  %v451_v26 = vmul.f32 (!%p3953_p9), %v3956_v23, %v5218_v1  ;;  %v452_v27 = vmul.f32 (!%p3953_p9), %v3957_v24, %v5218_v1  ;;  %v453_v28 = vmul.f32 (!%p3953_p9), %v3958_v25, %v5218_v1  ;;  %v3959_v29 = vld [vmem:[%s5226_s18 + $0x98] sm:$0xff] (!%p3953_p9) }
  0x37   : > { %v454_v30 = vmul.f32 (!%p3953_p9), %v3959_v29, %v5218_v1 }
  0x38   : > { %v455_v31 = vadd.f32 (!%p3953_p9), %v5223_v2, %v451_v26  ;;  %v456_v32 = vadd.f32 (!%p3953_p9), %v5223_v2, %v452_v27  ;;  %v457_v33 = vadd.f32 (!%p3953_p9), %v5223_v2, %v453_v28 }
  0x39   : > { %v458_v34 = vadd.f32 (!%p3953_p9), %v5223_v2, %v454_v30 }
  0x3a   : > { %v459_v35 = vmax.f32 (!%p3953_p9), %v455_v31, 0.0  ;;  %v460_v36 = vmax.f32 (!%p3953_p9), %v456_v32, 0.0  ;;  %v461_v37 = vmax.f32 (!%p3953_p9), %v457_v33, 0.0 }
  0x3b   : > { %v462_v38 = vmax.f32 (!%p3953_p9), %v458_v34, 0.0 }
  0x3c   : > { %464 = vst.msk [vmem:[#allocation2 + $0xf1] sm:$0xff] (!%p3953_p9), %vm385_vm1, %v459_v35  ;;  %465 = vst.msk [vmem:[#allocation2 + $0xf9] sm:$0xff] (!%p3953_p9), %vm385_vm1, %v460_v36 }
  0x3d   : > { %466 = vst.msk [vmem:[#allocation2 + $0x109] sm:$0xff] %vm385_vm1, %v461_v37  ;;  %467 = vst.msk [vmem:[#allocation2 + $0x111] sm:$0xff] %vm385_vm1, %v462_v38 }
  0x3e PF: > { %p3960_p10 = scmp.ne.s32.totalorder %s5060_s21, 1 }
  0x3f   : > { %vm475_vm3 = vcmask (!%p3960_p10), 25600   ;;  %v5080_v1 = vmov (!%p3960_p10), 0.0  }
  0x40   : > { %471 = sbr.rel (%p3960_p10) target bundleno = 71 (0x47), region = 60  ;;  %473 = vst.msk [vmem:[#allocation2 + $0xf0] sm:$0xff] (!%p3960_p10), %vm385_vm1, %v5080_v1  ;;  %474 = vst.msk [vmem:[#allocation2 + $0xf8] sm:$0xff] (!%p3960_p10), %vm385_vm1, %v5080_v1 }
  0x41   : > { %477 = vst.msk [vmem:[#allocation2 + $0x108] sm:$0xff] (!%p3960_p10), %vm385_vm1, %v5080_v1  ;;  %478 = vst.msk [vmem:[#allocation2 + $0x110] sm:$0xff] (!%p3960_p10), %vm385_vm1, %v5080_v1 }
  0x42   : > { %476 = vst.msk [vmem:[#allocation2 + $0x100] sm:$0x3] (!%p3960_p10), %vm475_vm3, %v5080_v1  ;;  %479 = vst.msk [vmem:[#allocation2 + $0x118] sm:$0x3] (!%p3960_p10), %vm475_vm3, %v5080_v1 }
  0x47 PF: > { %v510_v2 = vld [vmem:[%s6006_s1] sm:$0x3]  ;;  %vm573_vm4 = vcmask 1041408   ;;  %v481_v40 = vld [vmem:[#allocation2 + $0x8] sm:$0xff]  ;;  %2270 = vst.msk [vmem:[#allocation3] sm:$0x1] %vm281_vm0, %v5078_v0 }
  0x48   : > { %v480_v39 = vld [vmem:[#allocation2] sm:$0xff]  ;;  %2271 = vst.msk [vmem:[#allocation3 + $0x18] sm:$0x1] %vm281_vm0, %v5078_v0  ;;  %2272 = vst.msk [vmem:[#allocation3 + $0x30] sm:$0x1] %vm281_vm0, %v5078_v0  ;;  %4976 = vmatprep.subr.msk.bf16.mxu0 %vm573_vm4, %v510_v2  ;;  %v721_v41 = vsel %vm573_vm4, %v510_v2, 0 }
  0x49   : > { %2273 = vst.msk [vmem:[#allocation3 + $0x48] sm:$0x1] %vm281_vm0, %v5078_v0  ;;  %2274 = vst.msk [vmem:[#allocation3 + $0x60] sm:$0x1] %vm281_vm0, %v5078_v0  ;;  %v500_v42 = vpack.c.bf16 %v481_v40, %v480_v39  ;;  %v482_v43 = vld [vmem:[#allocation2 + $0x18] sm:$0xff]  ;;  %v483_v44 = vld [vmem:[#allocation2 + $0x20] sm:$0xff]  ;;  %4350 = vmatpush3.bf16.msra.mxu0 %v721_v41 }
  0x4a   : > { %2275 = vst.msk [vmem:[#allocation3 + $0x78] sm:$0x1] %vm281_vm0, %v5078_v0  ;;  %2276 = vst.msk [vmem:[#allocation3 + $0x90] sm:$0x1] %vm281_vm0, %v5078_v0  ;;  %v3982_v45 = vld [vmem:[%s6006_s1 + $0x4] sm:$0x3]  ;;  %v5391_v46 = vpack.c.bf16 %v483_v44, %v482_v43 }
  0x4b   : > { %2277 = vst.msk [vmem:[#allocation3 + $0xa8] sm:$0x1] %vm281_vm0, %v5078_v0  ;;  %2278 = vst.msk [vmem:[#allocation3 + $0xc0] sm:$0x1] %vm281_vm0, %v5078_v0  ;;  %v484_v47 = vld [vmem:[#allocation2 + $0x30] sm:$0xff]  ;;  %v485_v48 = vld [vmem:[#allocation2 + $0x38] sm:$0xff]  ;;  %4351 = vmatprep.mubr.msk.bf16.mxu0 %vm385_vm1, %v500_v42  ;;  %4977 = vmatprep.subr.msk.bf16.mxu0 %vm573_vm4, %v3982_v45 }
  0x4c   : > { %2279 = vst.msk [vmem:[#allocation3 + $0xd8] sm:$0x1] %vm281_vm0, %v5078_v0  ;;  %2280 = vst.msk [vmem:[#allocation3 + $0x11] sm:$0x1] %vm281_vm0, %v5078_v0  ;;  %v5396_v49 = vpack.c.bf16 %v485_v48, %v484_v47  ;;  %4352 = vmatmul.mubr.msk.bf16.vlgmr.msra.gmra.mrb[0].mxu0 %vm385_vm1, %v5391_v46  ;;  %v486_v50 = vld [vmem:[#allocation2 + $0x48] sm:$0xff]  ;;  %v487_v51 = vld [vmem:[#allocation2 + $0x50] sm:$0xff] }
  0x4d   : > { %2281 = vst.msk [vmem:[#allocation3 + $0x29] sm:$0x1] %vm281_vm0, %v5078_v0  ;;  %2282 = vst.msk [vmem:[#allocation3 + $0x41] sm:$0x1] %vm281_vm0, %v5078_v0  ;;  %v488_v52 = vld [vmem:[#allocation2 + $0x60] sm:$0xff]  ;;  %v489_v53 = vld [vmem:[#allocation2 + $0x68] sm:$0xff]  ;;  %v5405_v55 = vpack.c.bf16 %v487_v51, %v486_v50 }
  0x4e   : > { %2283 = vst.msk [vmem:[#allocation3 + $0x59] sm:$0x1] %vm281_vm0, %v5078_v0  ;;  %2284 = vst.msk [vmem:[#allocation3 + $0x71] sm:$0x1] %vm281_vm0, %v5078_v0  ;;  %4355 = vmatprep.mubr.msk.bf16.mxu0 %vm385_vm1, %v5396_v49  ;;  %v3993_v54 = vld [vmem:[%s6006_s1 + $0x6] sm:$0x3]  ;;  %v5408_v56 = vpack.c.bf16 %v489_v53, %v488_v52 }
  0x4f   : > { %2285 = vst.msk [vmem:[#allocation3 + $0x89] sm:$0x1] %vm281_vm0, %v5078_v0  ;;  %2286 = vst.msk [vmem:[#allocation3 + $0xa1] sm:$0x1] %vm281_vm0, %v5078_v0  ;;  %v490_v57 = vld [vmem:[#allocation2 + $0x78] sm:$0xff]  ;;  %v491_v58 = vld [vmem:[#allocation2 + $0x80] sm:$0xff] }
  0x50   : > { %2287 = vst.msk [vmem:[#allocation3 + $0xb9] sm:$0x1] %vm281_vm0, %v5078_v0  ;;  %2288 = vst.msk [vmem:[#allocation3 + $0xd1] sm:$0x1] %vm281_vm0, %v5078_v0  ;;  %v492_v59 = vld [vmem:[#allocation2 + $0x90] sm:$0xff]  ;;  %v493_v60 = vld [vmem:[#allocation2 + $0x98] sm:$0xff]  ;;  %v5414_v61 = vpack.c.bf16 %v491_v58, %v490_v57 }
  0x51   : > { %2289 = vst.msk [vmem:[#allocation3 + $0xe9] sm:$0x1] %vm281_vm0, %v5078_v0  ;;  %v899_v0 = vsel %vm573_vm4, %v3982_v45, 0  ;;  %v5416_v62 = vpack.c.bf16 %v493_v60, %v492_v59  ;;  %v494_v63 = vld [vmem:[#allocation2 + $0xa8] sm:$0xff]  ;;  %v495_v3 = vld [vmem:[#allocation2 + $0xb0] sm:$0xff]  ;;  %v496_v4 = vld [vmem:[#allocation2 + $0xc0] sm:$0xff] }
  0x52   : > { %4372 = vmatpush3.bf16.msra.mxu0 %v899_v0  ;;  %v497_v5 = vld [vmem:[#allocation2 + $0xc8] sm:$0xff]  ;;  %v5422_v6 = vpack.c.bf16 %v495_v3, %v494_v63  ;;  %v498_v8 = vld [vmem:[#allocation2 + $0xd8] sm:$0xff]  ;;  %v499_v9 = vld [vmem:[#allocation2 + $0xe0] sm:$0xff]  ;;  %v1098_v20 = vsel %vm573_vm4, %v3993_v54, 0  ;;  %vm2315_vm5 = vcmask (!%p3952_p8), 25600  }
  0x53   : > { %4978 = vmatprep.subr.msk.bf16.mxu0 %vm573_vm4, %v3993_v54  ;;  %v5424_v7 = vpack.c.bf16 %v497_v5, %v496_v4  ;;  %v836_v10 = vld [vmem:[#allocation2 + $0x2] sm:$0xff]  ;;  %v837_v11 = vld [vmem:[#allocation2 + $0xa] sm:$0xff]  ;;  %v5430_v12 = vpack.c.bf16 %v499_v9, %v498_v8  ;;  %v838_v14 = vld [vmem:[#allocation2 + $0x1a] sm:$0xff] }
  0x54   : > { %4356 = vmatmul.mubr.msk.bf16.gmra.mrb[4].mxu0 %vm385_vm1, %v5405_v55  ;;  %v856_v13 = vpack.c.bf16 %v837_v11, %v836_v10  ;;  %v839_v15 = vld [vmem:[#allocation2 + $0x22] sm:$0xff]  ;;  %v840_v16 = vld [vmem:[#allocation2 + $0x32] sm:$0xff]  ;;  %v841_v17 = vld [vmem:[#allocation2 + $0x3a] sm:$0xff] }
  0x55   : > { %4359 = vmatprep.mubr.msk.bf16.mxu0 %vm385_vm1, %v5408_v56  ;;  %v5435_v18 = vpack.c.bf16 %v839_v15, %v838_v14  ;;  %v5437_v19 = vpack.c.bf16 %v841_v17, %v840_v16  ;;  %v4004_v21 = vld [vmem:[%s6006_s1 + $0x8] sm:$0x3]  ;;  %v842_v22 = vld [vmem:[#allocation2 + $0x4a] sm:$0xff]  ;;  %v843_v23 = vld [vmem:[#allocation2 + $0x52] sm:$0xff] }
  0x56   : > { %v844_v24 = vld [vmem:[#allocation2 + $0x62] sm:$0xff]  ;;  %v845_v25 = vld [vmem:[#allocation2 + $0x6a] sm:$0xff]  ;;  %v5448_v26 = vpack.c.bf16 %v843_v23, %v842_v22  ;;  %v846_v28 = vld [vmem:[#allocation2 + $0x7a] sm:$0xff]  ;;  %v1296_v41 = vsel %vm573_vm4, %v4004_v21, 0 }
  0x57   : > { %v5450_v27 = vpack.c.bf16 %v845_v25, %v844_v24  ;;  %v847_v29 = vld [vmem:[#allocation2 + $0x82] sm:$0xff]  ;;  %v848_v30 = vld [vmem:[#allocation2 + $0x92] sm:$0xff]  ;;  %v849_v31 = vld [vmem:[#allocation2 + $0x9a] sm:$0xff] }
  0x58   : > { %v5456_v32 = vpack.c.bf16 %v847_v29, %v846_v28  ;;  %v5458_v33 = vpack.c.bf16 %v849_v31, %v848_v30  ;;  %v850_v34 = vld [vmem:[#allocation2 + $0xaa] sm:$0xff]  ;;  %v851_v35 = vld [vmem:[#allocation2 + $0xb2] sm:$0xff]  ;;  %v852_v36 = vld [vmem:[#allocation2 + $0xc2] sm:$0xff] }
  0x59   : > { %v853_v37 = vld [vmem:[#allocation2 + $0xca] sm:$0xff]  ;;  %v5464_v38 = vpack.c.bf16 %v851_v35, %v850_v34  ;;  %v854_v2 = vld [vmem:[#allocation2 + $0xda] sm:$0xff]  ;;  %v855_v39 = vld [vmem:[#allocation2 + $0xe2] sm:$0xff] }
  0x5a   : > { %v5466_v1 = vpack.c.bf16 %v853_v37, %v852_v36  ;;  %v5472_v40 = vpack.c.bf16 %v855_v39, %v854_v2  ;;  %v4015_v42 = vld [vmem:[%s6006_s1 + $0xa] sm:$0x3]  ;;  %v1053_v43 = vld [vmem:[#allocation2 + $0xf0] sm:$0xff]  ;;  %v1054_v44 = vld [vmem:[#allocation2 + $0xf8] sm:$0xff] }
  0x5b   : > { %v1233_v45 = vld [vmem:[#allocation2 + $0x19] sm:$0xff]  ;;  %v5499_v47 = vpack.c.bf16 %v1054_v44, %v1053_v43  ;;  %v1235_v0 = vld [vmem:[#allocation2 + $0x31] sm:$0xff]  ;;  %v1237_v51 = vld [vmem:[#allocation2 + $0x49] sm:$0xff]  ;;  %v1494_v57 = vsel %vm573_vm4, %v4015_v42, 0 }
  0x5c   : > { %4360 = vmatmul.mubr.msk.bf16.gmra.mrb[8].mxu0 %vm385_vm1, %v5414_v61  ;;  %v1236_v50 = vld [vmem:[#allocation2 + $0x39] sm:$0xff]  ;;  %v1238_v52 = vld [vmem:[#allocation2 + $0x51] sm:$0xff]  ;;  %v4026_v58 = vld [vmem:[%s6006_s1 + $0xc] sm:$0x3] }
  0x5d   : > { %4363 = vmatprep.mubr.msk.bf16.mxu0 %vm385_vm1, %v5416_v62  ;;  %v5504_v53 = vpack.c.bf16 %v1236_v50, %v1235_v0  ;;  %v5506_v54 = vpack.c.bf16 %v1238_v52, %v1237_v51  ;;  %v1239_v59 = vld [vmem:[#allocation2 + $0x61] sm:$0xff]  ;;  %v1240_v60 = vld [vmem:[#allocation2 + $0x69] sm:$0xff]  ;;  %v1241_v63 = vld [vmem:[#allocation2 + $0x79] sm:$0xff]  ;;  %v1692_v35 = vsel %vm573_vm4, %v4026_v58, 0 }
  0x5e   : > { %v1242_v3 = vld [vmem:[#allocation2 + $0x81] sm:$0xff]  ;;  %v5517_v4 = vpack.c.bf16 %v1240_v60, %v1239_v59  ;;  %v1243_v8 = vld [vmem:[#allocation2 + $0x91] sm:$0xff]  ;;  %v1244_v9 = vld [vmem:[#allocation2 + $0x99] sm:$0xff] }
  0x5f   : > { %v5519_v5 = vpack.c.bf16 %v1242_v3, %v1241_v63  ;;  %v1245_v10 = vld [vmem:[#allocation2 + $0xa9] sm:$0xff]  ;;  %v1246_v11 = vld [vmem:[#allocation2 + $0xb1] sm:$0xff]  ;;  %v1247_v15 = vld [vmem:[#allocation2 + $0xc1] sm:$0xff] }
  0x60   : > { %v5527_v14 = vpack.c.bf16 %v1246_v11, %v1245_v10  ;;  %v1248_v16 = vld [vmem:[#allocation2 + $0xc9] sm:$0xff]  ;;  %v1249_v17 = vld [vmem:[#allocation2 + $0xd9] sm:$0xff]  ;;  %v3961_v23 = vld [vmem:[%s6006_s1 + $0x2] sm:$0x3] }
  0x61   : > { %v511_v24 = vld [vmem:[#allocation2 + $0x1] sm:$0xff]  ;;  %v512_v25 = vld [vmem:[#allocation2 + $0x9] sm:$0xff]  ;;  %v1251_v28 = vld [vmem:[#allocation2 + $0xf1] sm:$0xff]  ;;  %4975 = vmatprep.subr.msk.bf16.mxu1 %vm573_vm4, %v3961_v23  ;;  %v575_v30 = vsel %vm573_vm4, %v3961_v23, 0 }
  0x62   : > { %v1252_v29 = vld [vmem:[#allocation2 + $0xf9] sm:$0xff]  ;;  %v531_v31 = vpack.c.bf16 %v512_v25, %v511_v24  ;;  %4328 = vmatpush3.bf16.msra.mxu1 %v575_v30  ;;  %v4037_v36 = vld [vmem:[%s6006_s1 + $0xe] sm:$0x3] }
  0x63   : > { %v1262_v34 = vpack.c.bf16 %v1252_v29, %v1251_v28  ;;  %v1450_v37 = vld [vmem:[#allocation2 + $0xfa] sm:$0xff]  ;;  %v1890_v39 = vsel %vm573_vm4, %v4037_v36, 0 }
  0x64   : > { %4364 = vmatmul.mubr.msk.bf16.gmra.mrb[12].mxu0 %vm385_vm1, %v5422_v6  ;;  %4329 = vmatprep.mubr.msk.bf16.mxu1 %vm385_vm1, %v531_v31  ;;  %v5669_v59 = vld [vmem:[%s6010_s5] ss:$0 sm:$0xff] }
  0x65   : > { %4367 = vmatprep.mubr.msk.bf16.mxu0 %vm385_vm1, %v5424_v7 }
  0x6c   : > { %4368 = vmatmul.mubr.msk.bf16.gmra.mrb[16].mxu0 %vm385_vm1, %v5430_v12 }
  0x6d   : > { %4373 = vmatprep.mubr.msk.bf16.mxu0 %vm385_vm1, %v856_v13  ;;  %v5525_v13 = vpack.c.bf16 %v1244_v9, %v1243_v8 }
  0x74   : > { %4374 = vmatmul.mubr.msk.bf16.vlgmr.msra.gmra.mrb[0].mxu0 %vm385_vm1, %v5435_v18 }
  0x75   : > { %4394 = vmatpush3.bf16.msra.mxu0 %v1098_v20  ;;  %4377 = vmatprep.mubr.msk.bf16.mxu0 %vm385_vm1, %v5437_v19  ;;  %v1250_v20 = vld [vmem:[#allocation2 + $0xe1] sm:$0xff] }
  0x76   : > { %4979 = vmatprep.subr.msk.bf16.mxu0 %vm573_vm4, %v4004_v21  ;;  %v5533_v21 = vpack.c.bf16 %v1248_v16, %v1247_v15  ;;  %v5535_v22 = vpack.c.bf16 %v1250_v20, %v1249_v17 }
  0x7c   : > { %4378 = vmatmul.mubr.msk.bf16.gmra.mrb[4].mxu0 %vm385_vm1, %v5448_v26 }
  0x7d   : > { %4381 = vmatprep.mubr.msk.bf16.mxu0 %vm385_vm1, %v5450_v27 }
  0x84   : > { %4382 = vmatmul.mubr.msk.bf16.gmra.mrb[8].mxu0 %vm385_vm1, %v5456_v32 }
  0x85   : > { %4385 = vmatprep.mubr.msk.bf16.mxu0 %vm385_vm1, %v5458_v33 }
  0x8c   : > { %4386 = vmatmul.mubr.msk.bf16.gmra.mrb[12].mxu0 %vm385_vm1, %v5464_v38 }
  0x8d   : > { %4389 = vmatprep.mubr.msk.bf16.mxu0 %vm385_vm1, %v5466_v1 }
  0x94   : > { %4390 = vmatmul.mubr.msk.bf16.gmra.mrb[16].mxu0 %vm385_vm1, %v5472_v40 }
  0x95   : > { %4395 = vmatprep.mubr.msk.bf16.mxu0 %vm385_vm1, %v5391_v46  ;;  %v1234_v46 = vld [vmem:[#allocation2 + $0x21] sm:$0xff] }
  0x96   : > { %v1253_v48 = vpack.c.bf16 %v1234_v46, %v1233_v45 }
  0x98   : > { %4330 = vmatmul.mubr.msk.bf16.vlgmr.msra.gmra.mrb[0].mxu1 %vm385_vm1, %v1253_v48 }
  0x99   : > { %4333 = vmatprep.mubr.msk.bf16.mxu1 %vm385_vm1, %v5504_v53 }
  0x9c   : > { %4396 = vmatmul.mubr.msk.bf16.vlgmr.msra.gmra.mrb[0].mxu0 %vm385_vm1, %v5396_v49 }
  0x9d   : > { %4416 = vmatpush3.bf16.msra.mxu0 %v1296_v41  ;;  %4399 = vmatprep.mubr.msk.bf16.mxu0 %vm385_vm1, %v5405_v55  ;;  %v4048_v41 = vld [vmem:[%s6006_s1 + $0x10] sm:$0x3] }
  0x9e   : > { %4980 = vmatprep.subr.msk.bf16.mxu0 %vm573_vm4, %v4015_v42 }
  0xa0   : > { %4334 = vmatmul.mubr.msk.bf16.gmra.mrb[4].mxu1 %vm385_vm1, %v5506_v54 }
  0xa1   : > { %4337 = vmatprep.mubr.msk.bf16.mxu1 %vm385_vm1, %v5517_v4 }
  0xa4   : > { %4400 = vmatmul.mubr.msk.bf16.gmra.mrb[4].mxu0 %vm385_vm1, %v5408_v56 }
  0xa5   : > { %4403 = vmatprep.mubr.msk.bf16.mxu0 %vm385_vm1, %v5414_v61 }
  0xa8   : > { %4338 = vmatmul.mubr.msk.bf16.gmra.mrb[8].mxu1 %vm385_vm1, %v5519_v5 }
  0xa9   : > { %4341 = vmatprep.mubr.msk.bf16.mxu1 %vm385_vm1, %v5525_v13 }
  0xac   : > { %4404 = vmatmul.mubr.msk.bf16.gmra.mrb[8].mxu0 %vm385_vm1, %v5416_v62 }
  0xad   : > { %4407 = vmatprep.mubr.msk.bf16.mxu0 %vm385_vm1, %v5422_v6 }
  0xb0   : > { %4342 = vmatmul.mubr.msk.bf16.gmra.mrb[12].mxu1 %vm385_vm1, %v5527_v14 }
  0xb1   : > { %4345 = vmatprep.mubr.msk.bf16.mxu1 %vm385_vm1, %v5533_v21 }
  0xb4   : > { %4408 = vmatmul.mubr.msk.bf16.gmra.mrb[12].mxu0 %vm385_vm1, %v5424_v7 }
  0xb5   : > { %4411 = vmatprep.mubr.msk.bf16.mxu0 %vm385_vm1, %v5430_v12 }
  0xb8   : > { %4346 = vmatmul.mubr.msk.bf16.gmra.mrb[16].mxu1 %vm385_vm1, %v5535_v22 }
  0xbc   : > { %4412 = vmatmul.mubr.msk.bf16.gmra.mrb[16].mxu0 %vm385_vm1, %v5499_v47 }
  0xbd   : > { %4417 = vmatprep.mubr.msk.bf16.mxu0 %vm385_vm1, %v1253_v48 }
  0xc4   : > { %4418 = vmatmul.mubr.msk.bf16.vlgmr.msra.gmra.mrb[0].mxu0 %vm385_vm1, %v5504_v53 }
  0xc5   : > { %4438 = vmatpush3.bf16.msra.mxu0 %v1494_v57  ;;  %4421 = vmatprep.mubr.msk.bf16.mxu0 %vm385_vm1, %v5506_v54 }
  0xc6   : > { %4981 = vmatprep.subr.msk.bf16.mxu0 %vm573_vm4, %v4026_v58 }
  0xcc   : > { %4422 = vmatmul.mubr.msk.bf16.gmra.mrb[4].mxu0 %vm385_vm1, %v5517_v4 }
  0xcd   : > { %4425 = vmatprep.mubr.msk.bf16.mxu0 %vm385_vm1, %v5519_v5 }
  0xd4   : > { %4426 = vmatmul.mubr.msk.bf16.gmra.mrb[8].mxu0 %vm385_vm1, %v5525_v13 }
  0xd5   : > { %4429 = vmatprep.mubr.msk.bf16.mxu0 %vm385_vm1, %v5527_v14 }
  0xdc   : > { %4430 = vmatmul.mubr.msk.bf16.gmra.mrb[12].mxu0 %vm385_vm1, %v5533_v21 }
  0xdd   : > { %4433 = vmatprep.mubr.msk.bf16.mxu0 %vm385_vm1, %v5535_v22 }
  0xe4   : > { %4434 = vmatmul.mubr.msk.bf16.gmra.mrb[16].mxu0 %vm385_vm1, %v1262_v34 }
  0xe5   : > { %4439 = vmatprep.mubr.msk.bf16.mxu0 %vm385_vm1, %v5435_v18  ;;  %v1449_v18 = vld [vmem:[#allocation2 + $0xf2] sm:$0xff] }
  0xe6   : > { %v1460_v2 = vpack.c.bf16 %v1450_v37, %v1449_v18 }
  0xec   : > { %4440 = vmatmul.mubr.msk.bf16.vlgmr.msra.gmra.mrb[0].mxu0 %vm385_vm1, %v5437_v19 }
  0xed   : > { %4460 = vmatpush3.bf16.msra.mxu0 %v1692_v35  ;;  %4443 = vmatprep.mubr.msk.bf16.mxu0 %vm385_vm1, %v5448_v26 }
  0xee   : > { %4982 = vmatprep.subr.msk.bf16.mxu0 %vm573_vm4, %v4037_v36 }
  0xf4   : > { %4444 = vmatmul.mubr.msk.bf16.gmra.mrb[4].mxu0 %vm385_vm1, %v5450_v27 }
  0xf5   : > { %4447 = vmatprep.mubr.msk.bf16.mxu0 %vm385_vm1, %v5456_v32 }
  0xfc   : > { %4448 = vmatmul.mubr.msk.bf16.gmra.mrb[8].mxu0 %vm385_vm1, %v5458_v33 }
  0xfd   : > { %4451 = vmatprep.mubr.msk.bf16.mxu0 %vm385_vm1, %v5464_v38 }
 0x104   : > { %4452 = vmatmul.mubr.msk.bf16.gmra.mrb[12].mxu0 %vm385_vm1, %v5466_v1 }
 0x105   : > { %4455 = vmatprep.mubr.msk.bf16.mxu0 %vm385_vm1, %v5472_v40 }
 0x10c   : > { %4456 = vmatmul.mubr.msk.bf16.gmra.mrb[16].mxu0 %vm385_vm1, %v1460_v2 }
 0x10d   : > { %4461 = vmatprep.mubr.msk.bf16.mxu0 %vm385_vm1, %v5396_v49  ;;  %v1647_v49 = vld [vmem:[#allocation2 + $0x108] sm:$0xff] }
 0x114   : > { %4462 = vmatmul.mubr.msk.bf16.vlgmr.msra.gmra.mrb[0].mxu0 %vm385_vm1, %v5405_v55  ;;  %v1648_v55 = vld [vmem:[#allocation2 + $0x110] sm:$0xff] }
 0x115   : > { %4482 = vmatpush3.bf16.msra.mxu0 %v1890_v39  ;;  %4465 = vmatprep.mubr.msk.bf16.mxu0 %vm385_vm1, %v5408_v56  ;;  %v1658_v56 = vpack.c.bf16 %v1648_v55, %v1647_v49 }
 0x116   : > { %4983 = vmatprep.subr.msk.bf16.mxu0 %vm573_vm4, %v4048_v41 }
 0x11c   : > { %4466 = vmatmul.mubr.msk.bf16.gmra.mrb[4].mxu0 %vm385_vm1, %v5414_v61  ;;  %v2088_v61 = vsel %vm573_vm4, %v4048_v41, 0 }
 0x11d   : > { %4469 = vmatprep.mubr.msk.bf16.mxu0 %vm385_vm1, %v5416_v62  ;;  %v1845_v62 = vld [vmem:[#allocation2 + $0x109] sm:$0xff] }
 0x124   : > { %4470 = vmatmul.mubr.msk.bf16.gmra.mrb[8].mxu0 %vm385_vm1, %v5422_v6  ;;  %v1846_v6 = vld [vmem:[#allocation2 + $0x111] sm:$0xff] }
 0x125   : > { %4473 = vmatprep.mubr.msk.bf16.mxu0 %vm385_vm1, %v5424_v7  ;;  %v1856_v7 = vpack.c.bf16 %v1846_v6, %v1845_v62 }
 0x12c   : > { %4474 = vmatmul.mubr.msk.bf16.gmra.mrb[12].mxu0 %vm385_vm1, %v5430_v12  ;;  %v2043_v12 = vld [vmem:[#allocation2 + $0x10a] sm:$0xff] }
 0x12d   : > { %4477 = vmatprep.mubr.msk.bf16.mxu0 %vm385_vm1, %v5499_v47 }
 0x134   : > { %4478 = vmatmul.mubr.msk.bf16.gmra.mrb[16].mxu0 %vm385_vm1, %v1658_v56 }
 0x135   : > { %4483 = vmatprep.mubr.msk.bf16.mxu0 %vm385_vm1, %v5504_v53 }
 0x13c   : > { %4484 = vmatmul.mubr.msk.bf16.vlgmr.msra.gmra.mrb[0].mxu0 %vm385_vm1, %v5506_v54 }
 0x13d   : > { %4504 = vmatpush3.bf16.msra.mxu0 %v2088_v61  ;;  %4487 = vmatprep.mubr.msk.bf16.mxu0 %vm385_vm1, %v5517_v4 }
 0x144   : > { %4488 = vmatmul.mubr.msk.bf16.gmra.mrb[4].mxu0 %vm385_vm1, %v5519_v5 }
 0x145   : > { %4491 = vmatprep.mubr.msk.bf16.mxu0 %vm385_vm1, %v5525_v13 }
 0x14c   : > { %4492 = vmatmul.mubr.msk.bf16.gmra.mrb[8].mxu0 %vm385_vm1, %v5527_v14 }
 0x14d   : > { %4495 = vmatprep.mubr.msk.bf16.mxu0 %vm385_vm1, %v5533_v21 }
 0x154   : > { %4496 = vmatmul.mubr.msk.bf16.gmra.mrb[12].mxu0 %vm385_vm1, %v5535_v22 }
 0x155   : > { %4499 = vmatprep.mubr.msk.bf16.mxu0 %vm385_vm1, %v1262_v34 }
 0x15c   : > { %4500 = vmatmul.mubr.msk.bf16.gmra.mrb[16].mxu0 %vm385_vm1, %v1856_v7 }
 0x15d   : > { %4505 = vmatprep.mubr.msk.bf16.mxu0 %vm385_vm1, %v5437_v19  ;;  %v2044_v19 = vld [vmem:[#allocation2 + $0x112] sm:$0xff] }
 0x164   : > { %4506 = vmatmul.mubr.msk.bf16.vlgmr.msra.gmra.mrb[0].mxu0 %vm385_vm1, %v5448_v26  ;;  %v2054_v26 = vpack.c.bf16 %v2044_v19, %v2043_v12 }
 0x165   : > { %4509 = vmatprep.mubr.msk.bf16.mxu0 %vm385_vm1, %v5450_v27 }
 0x16b   : > { %v4331_v27 = vpop.f32.mrb[0].mxu1 }
 0x16c   : > { %4510 = vmatmul.mubr.msk.bf16.gmra.mrb[4].mxu0 %vm385_vm1, %v5456_v32  ;;  %v611_v32 = vpop.f32.mrb[1].mxu1 }
 0x16d   : > { %4513 = vmatprep.mubr.msk.bf16.mxu0 %vm385_vm1, %v5458_v33  ;;  %v4332_v42 = vpop.f32.mrb[2].mxu1 }
 0x16e   : > { %v614_v33 = vpop.f32.mrb[3].mxu1 }
 0x173   : > { %v4335_v43 = vpop.f32.mrb[4].mxu1 }
 0x174   : > { %4514 = vmatmul.mubr.msk.bf16.gmra.mrb[8].mxu0 %vm385_vm1, %v5464_v38  ;;  %v627_v44 = vpop.f32.mrb[5].mxu1 }
 0x175   : > { %4517 = vmatprep.mubr.msk.bf16.mxu0 %vm385_vm1, %v5466_v1  ;;  %v4336_v38 = vpop.f32.mrb[6].mxu1 }
 0x176   : > { %v630_v45 = vpop.f32.mrb[7].mxu1 }
 0x17b   : > { %v4339_v46 = vpop.f32.mrb[8].mxu1 }
 0x17c   : > { %4518 = vmatmul.mubr.msk.bf16.gmra.mrb[12].mxu0 %vm385_vm1, %v5472_v40  ;;  %v643_v1 = vpop.f32.mrb[9].mxu1 }
 0x17d   : > { %4521 = vmatprep.mubr.msk.bf16.mxu0 %vm385_vm1, %v1460_v2  ;;  %v4340_v47 = vpop.f32.mrb[10].mxu1 }
 0x17e   : > { %v646_v48 = vpop.f32.mrb[11].mxu1 }
 0x183   : > { %v5650_v40 = vpop.f32.mrb[12].mxu1 }
 0x184   : > { %4522 = vmatmul.mubr.msk.bf16.gmra.mrb[16].mxu0 %vm385_vm1, %v2054_v26  ;;  %v5652_v0 = vpop.f32.mrb[13].mxu1 }
 0x185   : > { %v5654_v50 = vpop.f32.mrb[14].mxu1 }
 0x186   : > { %v5656_v51 = vpop.f32.mrb[15].mxu1 }
 0x18b   : > { %v5658_v52 = vpop.f32.mrb[16].mxu1 }
 0x18c   : > { %v5660_v53 = vpop.f32.mrb[17].mxu1 }
 0x18d   : > { %v5662_v54 = vpop.f32.mrb[18].mxu1 }
 0x18e   : > { %v5664_v57 = vpop.f32.mrb[19].mxu1 }
 0x237   : > { %v4507_v58 = vpop.f32.mrb[0].mxu0 }
 0x238   : > { %v4687_v60 = vadd.f32 %v4507_v58, %v4331_v27  ;;  %v2124_v63 = vpop.f32.mrb[1].mxu0 }
 0x239   : > { %v4688_v3 = vadd.f32 %v2124_v63, %v611_v32  ;;  %v4508_v4 = vpop.f32.mrb[2].mxu0 }
 0x23a   : > { %v2232_v5 = vadd.f32 %v4687_v60, %v5669_v59  ;;  %v4689_v8 = vadd.f32 %v4508_v4, %v4332_v42  ;;  %v2127_v9 = vpop.f32.mrb[3].mxu0 }
 0x23b   : > { %v2230_v10 = vadd.f32 %v4688_v3, %v5669_v59  ;;  %v4690_v11 = vadd.f32 %v2127_v9, %v614_v33 }
 0x23c   : > { %v2252_v13 = vmax.f32 %v2232_v5, 0.0  ;;  %v2233_v14 = vadd.f32 %v4689_v8, %v5669_v59 }
 0x23d   : > { %v2250_v15 = vmax.f32 %v2230_v10, 0.0  ;;  %v2231_v16 = vadd.f32 %v4690_v11, %v5669_v59 }
 0x23e   : > { %2292 = vst.msk [vmem:[#allocation3 + $0x19] sm:$0xff] %vm385_vm1, %v2252_v13  ;;  %v2253_v17 = vmax.f32 %v2233_v14, 0.0 }
 0x23f   : > { %2290 = vst.msk [vmem:[#allocation3 + $0x1] sm:$0xff] %vm385_vm1, %v2250_v15  ;;  %v2251_v20 = vmax.f32 %v2231_v16, 0.0  ;;  %v4511_v21 = vpop.f32.mrb[4].mxu0 }
 0x240   : > { %2293 = vst.msk [vmem:[#allocation3 + $0x21] sm:$0xff] %vm385_vm1, %v2253_v17  ;;  %v4691_v22 = vadd.f32 %v4511_v21, %v4335_v43  ;;  %v2140_v23 = vpop.f32.mrb[5].mxu0 }
 0x241   : > { %2291 = vst.msk [vmem:[#allocation3 + $0x9] sm:$0xff] %vm385_vm1, %v2251_v20  ;;  %v4692_v24 = vadd.f32 %v2140_v23, %v627_v44  ;;  %v4512_v25 = vpop.f32.mrb[6].mxu0 }
 0x242   : > { %v2236_v28 = vadd.f32 %v4691_v22, %v5669_v59  ;;  %v4693_v29 = vadd.f32 %v4512_v25, %v4336_v38  ;;  %v2143_v30 = vpop.f32.mrb[7].mxu0 }
 0x243   : > { %v2234_v31 = vadd.f32 %v4692_v24, %v5669_v59  ;;  %v4694_v34 = vadd.f32 %v2143_v30, %v630_v45 }
 0x244   : > { %v2256_v35 = vmax.f32 %v2236_v28, 0.0  ;;  %v2237_v36 = vadd.f32 %v4693_v29, %v5669_v59 }
 0x245   : > { %v2254_v18 = vmax.f32 %v2234_v31, 0.0  ;;  %v2235_v37 = vadd.f32 %v4694_v34, %v5669_v59 }
 0x246   : > { %2296 = vst.msk [vmem:[#allocation3 + $0x49] sm:$0xff] %vm385_vm1, %v2256_v35  ;;  %v2257_v2 = vmax.f32 %v2237_v36, 0.0 }
 0x247   : > { %2294 = vst.msk [vmem:[#allocation3 + $0x31] sm:$0xff] %vm385_vm1, %v2254_v18  ;;  %v2255_v39 = vmax.f32 %v2235_v37, 0.0  ;;  %v4515_v41 = vpop.f32.mrb[8].mxu0 }
 0x248   : > { %2297 = vst.msk [vmem:[#allocation3 + $0x51] sm:$0xff] %vm385_vm1, %v2257_v2  ;;  %v4695_v49 = vadd.f32 %v4515_v41, %v4339_v46  ;;  %v2156_v55 = vpop.f32.mrb[9].mxu0 }
 0x249   : > { %2295 = vst.msk [vmem:[#allocation3 + $0x39] sm:$0xff] %vm385_vm1, %v2255_v39  ;;  %v4696_v56 = vadd.f32 %v2156_v55, %v643_v1  ;;  %v4516_v61 = vpop.f32.mrb[10].mxu0 }
 0x24a   : > { %v2240_v62 = vadd.f32 %v4695_v49, %v5669_v59  ;;  %v4697_v6 = vadd.f32 %v4516_v61, %v4340_v47  ;;  %v2159_v7 = vpop.f32.mrb[11].mxu0 }
 0x24b   : > { %v2238_v12 = vadd.f32 %v4696_v56, %v5669_v59  ;;  %v4698_v19 = vadd.f32 %v2159_v7, %v646_v48 }
 0x24c   : > { %v2260_v26 = vmax.f32 %v2240_v62, 0.0  ;;  %v2241_v27 = vadd.f32 %v4697_v6, %v5669_v59 }
 0x24d   : > { %v2258_v32 = vmax.f32 %v2238_v12, 0.0  ;;  %v2239_v42 = vadd.f32 %v4698_v19, %v5669_v59 }
 0x24e   : > { %2300 = vst.msk [vmem:[#allocation3 + $0x79] sm:$0xff] %vm385_vm1, %v2260_v26  ;;  %v2261_v33 = vmax.f32 %v2241_v27, 0.0 }
 0x24f   : > { %2298 = vst.msk [vmem:[#allocation3 + $0x61] sm:$0xff] %vm385_vm1, %v2258_v32  ;;  %v2259_v43 = vmax.f32 %v2239_v42, 0.0  ;;  %v4519_v44 = vpop.f32.mrb[12].mxu0 }
 0x250   : > { %2301 = vst.msk [vmem:[#allocation3 + $0x81] sm:$0xff] %vm385_vm1, %v2261_v33  ;;  %v4699_v38 = vadd.f32 %v4519_v44, %v5650_v40  ;;  %v2172_v45 = vpop.f32.mrb[13].mxu0 }
 0x251   : > { %2299 = vst.msk [vmem:[#allocation3 + $0x69] sm:$0xff] %vm385_vm1, %v2259_v43  ;;  %v4700_v46 = vadd.f32 %v2172_v45, %v5652_v0  ;;  %v4520_v1 = vpop.f32.mrb[14].mxu0 }
 0x252   : > { %v2244_v47 = vadd.f32 %v4699_v38, %v5669_v59  ;;  %v4701_v48 = vadd.f32 %v4520_v1, %v5654_v50  ;;  %v2175_v58 = vpop.f32.mrb[15].mxu0 }
 0x253   : > { %v2242_v60 = vadd.f32 %v4700_v46, %v5669_v59  ;;  %v4702_v63 = vadd.f32 %v2175_v58, %v5656_v51 }
 0x254   : > { %v2264_v3 = vmax.f32 %v2244_v47, 0.0  ;;  %v2245_v4 = vadd.f32 %v4701_v48, %v5669_v59 }
 0x255   : > { %v2262_v5 = vmax.f32 %v2242_v60, 0.0  ;;  %v2243_v40 = vadd.f32 %v4702_v63, %v5669_v59 }
 0x256   : > { %2304 = vst.msk [vmem:[#allocation3 + $0xa9] sm:$0xff] %vm385_vm1, %v2264_v3  ;;  %v2265_v8 = vmax.f32 %v2245_v4, 0.0 }
 0x257   : > { %2302 = vst.msk [vmem:[#allocation3 + $0x91] sm:$0xff] %vm385_vm1, %v2262_v5  ;;  %v2263_v0 = vmax.f32 %v2243_v40, 0.0  ;;  %v4523_v9 = vpop.f32.mrb[16].mxu0 }
 0x258   : > { %2305 = vst.msk [vmem:[#allocation3 + $0xb1] sm:$0xff] %vm385_vm1, %v2265_v8  ;;  %v4703_v50 = vadd.f32 %v4523_v9, %v5658_v52  ;;  %v2188_v10 = vpop.f32.mrb[17].mxu0 }
 0x259   : > { %2303 = vst.msk [vmem:[#allocation3 + $0x99] sm:$0xff] %vm385_vm1, %v2263_v0  ;;  %v4704_v51 = vadd.f32 %v2188_v10, %v5660_v53  ;;  %v4524_v11 = vpop.f32.mrb[18].mxu0 }
 0x25a   : > { %v2248_v13 = vadd.f32 %v4703_v50, %v5669_v59  ;;  %v4705_v14 = vadd.f32 %v4524_v11, %v5662_v54  ;;  %v2191_v15 = vpop.f32.mrb[19].mxu0  ;;  %v5081_v54 = vmov (!%p3952_p8), 0.0  }
 0x25b   : > { %v2246_v16 = vadd.f32 %v4704_v51, %v5669_v59  ;;  %v4706_v17 = vadd.f32 %v2191_v15, %v5664_v57  ;;  %2312 = sbr.rel (%p3952_p8) target bundleno = 610 (0x262), region = 64  ;;  %2313 = vst.msk [vmem:[#allocation3] sm:$0xff] (!%p3952_p8), %vm385_vm1, %v5081_v54  ;;  %2314 = vst.msk [vmem:[#allocation3 + $0x8] sm:$0xff] (!%p3952_p8), %vm385_vm1, %v5081_v54 }
 0x25c   : > { %v2268_v20 = vmax.f32 %v2248_v13, 0.0  ;;  %v2249_v21 = vadd.f32 %v4705_v14, %v5669_v59  ;;  %2316 = vst.msk [vmem:[#allocation3 + $0x10] sm:$0x3] (!%p3952_p8), %vm2315_vm5, %v5081_v54 }
 0x25d   : > { %v2266_v22 = vmax.f32 %v2246_v16, 0.0  ;;  %v2247_v52 = vadd.f32 %v4706_v17, %v5669_v59 }
 0x25e   : > { %2308 = vst.msk [vmem:[#allocation3 + $0xd9] sm:$0xff] %vm385_vm1, %v2268_v20  ;;  %v2269_v23 = vmax.f32 %v2249_v21, 0.0 }
 0x25f   : > { %2306 = vst.msk [vmem:[#allocation3 + $0xc1] sm:$0xff] %vm385_vm1, %v2266_v22  ;;  %v2267_v53 = vmax.f32 %v2247_v52, 0.0 }
 0x260   : > { %2309 = vst.msk [vmem:[#allocation3 + $0xe1] sm:$0xff] %vm385_vm1, %v2269_v23 }
 0x261   : > { %2307 = vst.msk [vmem:[#allocation3 + $0xc9] sm:$0xff] %vm385_vm1, %v2267_v53 }
 0x262 PF: > { %2319 = sbr.rel (%p3960_p10) target bundleno = 617 (0x269), region = 68  ;;  %vm2323_vm6 = vcmask (!%p3960_p10), 25600   ;;  %v5082_v57 = vmov (!%p3960_p10), 0.0  }
 0x263   : > { %2321 = vst.msk [vmem:[#allocation3 + $0xd8] sm:$0xff] (!%p3960_p10), %vm385_vm1, %v5082_v57  ;;  %2322 = vst.msk [vmem:[#allocation3 + $0xe0] sm:$0xff] (!%p3960_p10), %vm385_vm1, %v5082_v57 }
 0x264   : > { %2324 = vst.msk [vmem:[#allocation3 + $0xe8] sm:$0x3] (!%p3960_p10), %vm2323_vm6, %v5082_v57 }
 0x269 PF: > { %v4062_v59 = vld [vmem:[%s6007_s2 + $0x2] sm:$0x3]  ;;  %v2351_v25 = vld [vmem:[#allocation3 + $0x9] sm:$0xff]  ;;  %v2352_v30 = vld [vmem:[#allocation3 + $0x19] sm:$0xff] }
 0x26a   : > { %v2350_v24 = vld [vmem:[#allocation3 + $0x1] sm:$0xff]  ;;  %4984 = vmatprep.subr.msk.bf16.mxu1 %vm573_vm4, %v4062_v59  ;;  %v2401_v28 = vsel %vm573_vm4, %v4062_v59, 0  ;;  %v2354_v36 = vld [vmem:[#allocation3 + $0x31] sm:$0xff]  ;;  %v2355_v18 = vld [vmem:[#allocation3 + $0x39] sm:$0xff] }
 0x26b   : > { %v2366_v29 = vpack.c.bf16 %v2351_v25, %v2350_v24  ;;  %v2353_v31 = vld [vmem:[#allocation3 + $0x21] sm:$0xff]  ;;  %4526 = vmatpush3.bf16.msra.mxu1 %v2401_v28  ;;  %v5740_v2 = vpack.c.bf16 %v2355_v18, %v2354_v36  ;;  %v2356_v39 = vld [vmem:[#allocation3 + $0x49] sm:$0xff]  ;;  %v2357_v41 = vld [vmem:[#allocation3 + $0x51] sm:$0xff] }
 0x26c   : > { %v2349_v34 = vld [vmem:[%s6007_s2] sm:$0x3]  ;;  %v5735_v35 = vpack.c.bf16 %v2353_v31, %v2352_v30  ;;  %v2359_v55 = vld [vmem:[#allocation3 + $0x69] sm:$0xff]  ;;  %v4079_v56 = vld [vmem:[%s6007_s2 + $0x4] sm:$0x3]  ;;  %v5750_v61 = vpack.c.bf16 %v2357_v41, %v2356_v39 }
 0x26d   : > { %4527 = vmatprep.mubr.msk.bf16.mxu1 %vm385_vm1, %v2366_v29  ;;  %v2525_v37 = vsel %vm573_vm4, %v2349_v34, 0  ;;  %4985 = vmatprep.subr.msk.bf16.mxu1 %vm573_vm4, %v2349_v34  ;;  %v2358_v49 = vld [vmem:[#allocation3 + $0x61] sm:$0xff]  ;;  %v2360_v6 = vld [vmem:[#allocation3 + $0x79] sm:$0xff]  ;;  %v2362_v12 = vld [vmem:[#allocation3 + $0x91] sm:$0xff]  ;;  %v2675_v60 = vsel %vm573_vm4, %v4079_v56, 0 }
 0x26e   : > { %4528 = vmatmul.mubr.msk.bf16.vlgmr.msra.gmra.mrb[20].mxu1 %vm385_vm1, %v5735_v35  ;;  %v5752_v62 = vpack.c.bf16 %v2359_v55, %v2358_v49  ;;  %v2361_v7 = vld [vmem:[#allocation3 + $0x81] sm:$0xff]  ;;  %v2363_v19 = vld [vmem:[#allocation3 + $0x99] sm:$0xff]  ;;  %v2364_v32 = vld [vmem:[#allocation3 + $0xa9] sm:$0xff] }
 0x26f   : > { %4544 = vmatpush3.bf16.msra.mxu1 %v2525_v37  ;;  %4531 = vmatprep.mubr.msk.bf16.mxu1 %vm385_vm1, %v5740_v2  ;;  %v5758_v26 = vpack.c.bf16 %v2361_v7, %v2360_v6  ;;  %v5760_v27 = vpack.c.bf16 %v2363_v19, %v2362_v12  ;;  %v2365_v42 = vld [vmem:[#allocation3 + $0xb1] sm:$0xff]  ;;  %v2325_v33 = vld [vmem:[#allocation3] sm:$0xff]  ;;  %v2326_v43 = vld [vmem:[#allocation3 + $0x8] sm:$0xff] }
 0x270   : > { %4986 = vmatprep.subr.msk.bf16.mxu1 %vm573_vm4, %v4079_v56  ;;  %v5766_v44 = vpack.c.bf16 %v2365_v42, %v2364_v32  ;;  %v2341_v38 = vpack.c.bf16 %v2326_v43, %v2325_v33  ;;  %v2327_v45 = vld [vmem:[#allocation3 + $0x18] sm:$0xff]  ;;  %v2328_v46 = vld [vmem:[#allocation3 + $0x20] sm:$0xff]  ;;  %v2329_v1 = vld [vmem:[#allocation3 + $0x30] sm:$0xff] }
 0x271   : > { %v2330_v47 = vld [vmem:[#allocation3 + $0x38] sm:$0xff]  ;;  %v5771_v48 = vpack.c.bf16 %v2328_v46, %v2327_v45  ;;  %v4088_v63 = vld [vmem:[%s6007_s2 + $0x6] sm:$0x3]  ;;  %v2331_v3 = vld [vmem:[#allocation3 + $0x48] sm:$0xff] }
 0x272   : > { %v5773_v58 = vpack.c.bf16 %v2330_v47, %v2329_v1  ;;  %v2332_v4 = vld [vmem:[#allocation3 + $0x50] sm:$0xff]  ;;  %v2333_v5 = vld [vmem:[#allocation3 + $0x60] sm:$0xff]  ;;  %v2334_v40 = vld [vmem:[#allocation3 + $0x68] sm:$0xff]  ;;  %v2842_v59 = vsel %vm573_vm4, %v4088_v63, 0 }
 0x273   : > { %v5784_v8 = vpack.c.bf16 %v2332_v4, %v2331_v3  ;;  %v5786_v0 = vpack.c.bf16 %v2334_v40, %v2333_v5  ;;  %v2335_v9 = vld [vmem:[#allocation3 + $0x78] sm:$0xff]  ;;  %v2336_v50 = vld [vmem:[#allocation3 + $0x80] sm:$0xff]  ;;  %v2337_v10 = vld [vmem:[#allocation3 + $0x90] sm:$0xff] }
 0x274   : > { %v2338_v51 = vld [vmem:[#allocation3 + $0x98] sm:$0xff]  ;;  %v5792_v11 = vpack.c.bf16 %v2336_v50, %v2335_v9  ;;  %v2339_v14 = vld [vmem:[#allocation3 + $0xa8] sm:$0xff]  ;;  %v2340_v15 = vld [vmem:[#allocation3 + $0xb0] sm:$0xff] }
 0x275   : > { %v5794_v13 = vpack.c.bf16 %v2338_v51, %v2337_v10  ;;  %v2624_v16 = vld [vmem:[#allocation3 + $0x2] sm:$0xff]  ;;  %v2625_v17 = vld [vmem:[#allocation3 + $0xa] sm:$0xff]  ;;  %v5800_v20 = vpack.c.bf16 %v2340_v15, %v2339_v14  ;;  %v2626_v22 = vld [vmem:[#allocation3 + $0x1a] sm:$0xff] }
 0x276   : > { %4532 = vmatmul.mubr.msk.bf16.gmra.mrb[24].mxu1 %vm385_vm1, %v5750_v61  ;;  %v2640_v21 = vpack.c.bf16 %v2625_v17, %v2624_v16  ;;  %v2627_v52 = vld [vmem:[#allocation3 + $0x22] sm:$0xff]  ;;  %v2628_v23 = vld [vmem:[#allocation3 + $0x32] sm:$0xff]  ;;  %v2629_v53 = vld [vmem:[#allocation3 + $0x3a] sm:$0xff] }
 0x277   : > { %4535 = vmatprep.mubr.msk.bf16.mxu1 %vm385_vm1, %v5752_v62  ;;  %v2641_v54 = vpack.c.bf16 %v2627_v52, %v2626_v22  ;;  %v5805_v57 = vpack.c.bf16 %v2629_v53, %v2628_v23  ;;  %v4097_v24 = vld [vmem:[%s6007_s2 + $0x8] sm:$0x3]  ;;  %v2630_v25 = vld [vmem:[#allocation3 + $0x4a] sm:$0xff]  ;;  %v2631_v28 = vld [vmem:[#allocation3 + $0x52] sm:$0xff] }
 0x278   : > { %v2632_v29 = vld [vmem:[#allocation3 + $0x62] sm:$0xff]  ;;  %v2633_v30 = vld [vmem:[#allocation3 + $0x6a] sm:$0xff]  ;;  %v5815_v31 = vpack.c.bf16 %v2631_v28, %v2630_v25  ;;  %v2634_v36 = vld [vmem:[#allocation3 + $0x7a] sm:$0xff]  ;;  %v3008_v7 = vsel %vm573_vm4, %v4097_v24, 0 }
 0x279   : > { %v5817_v34 = vpack.c.bf16 %v2633_v30, %v2632_v29  ;;  %v2635_v18 = vld [vmem:[#allocation3 + $0x82] sm:$0xff]  ;;  %v2636_v37 = vld [vmem:[#allocation3 + $0x92] sm:$0xff]  ;;  %v2637_v39 = vld [vmem:[#allocation3 + $0x9a] sm:$0xff] }
 0x27a   : > { %v5823_v41 = vpack.c.bf16 %v2635_v18, %v2634_v36  ;;  %v5825_v49 = vpack.c.bf16 %v2637_v39, %v2636_v37  ;;  %v2638_v55 = vld [vmem:[#allocation3 + $0xaa] sm:$0xff]  ;;  %v2639_v56 = vld [vmem:[#allocation3 + $0xb2] sm:$0xff]  ;;  %v2805_v19 = vld [vmem:[#allocation3 + $0xc0] sm:$0xff] }
 0x27b   : > { %v5831_v6 = vpack.c.bf16 %v2639_v56, %v2638_v55  ;;  %v4106_v12 = vld [vmem:[%s6007_s2 + $0xa] sm:$0x3]  ;;  %v4115_v43 = vld [vmem:[%s6007_s2 + $0xc] sm:$0x3]  ;;  %v4124_v1 = vld [vmem:[%s6007_s2 + $0xe] sm:$0x3] }
 0x27c   : > { %v2806_v32 = vld [vmem:[#allocation3 + $0xc8] sm:$0xff]  ;;  %v3174_v33 = vsel %vm573_vm4, %v4106_v12, 0  ;;  %v3341_v46 = vsel %vm573_vm4, %v4115_v43, 0  ;;  %v4133_v3 = vld [vmem:[%s6007_s2 + $0x10] sm:$0x3]  ;;  %v3305_v4 = vld [vmem:[#allocation3 + $0xe0] sm:$0xff] }
 0x27d   : > { %v2814_v42 = vpack.c.bf16 %v2806_v32, %v2805_v19  ;;  %v3137_v47 = vld [vmem:[#allocation3 + $0xc2] sm:$0xff]  ;;  %v3673_v40 = vsel %vm573_vm4, %v4133_v3, 0  ;;  %v3791_v50 = vld [vmem:[%s5226_s18 + $0x18] sm:$0xff]  ;;  %v3798_v29 = vld [vmem:[%s5226_s18 + $0x50] sm:$0xff] }
 0x27e   : > { %4536 = vmatmul.mubr.msk.bf16.gmra.mrb[28].mxu1 %vm385_vm1, %v5758_v26  ;;  %v3795_v52 = vld [vmem:[%s5226_s18 + $0x38] sm:$0xff]  ;;  %v3796_v30 = vld [vmem:[%s5226_s18 + $0x40] sm:$0xff]  ;;  %v3797_v37 = vld [vmem:[%s5226_s18 + $0x48] sm:$0xff] }
 0x27f   : > { %4539 = vmatprep.mubr.msk.bf16.mxu1 %vm385_vm1, %v5760_v27  ;;  %v3803_v19 = vld [vmem:[%s5226_s18 + $0x78] sm:$0xff] }
 0x286   : > { %4540 = vmatmul.mubr.msk.bf16.gmra.mrb[32].mxu1 %vm385_vm1, %v5766_v44 }
 0x287   : > { %4545 = vmatprep.mubr.msk.bf16.mxu1 %vm385_vm1, %v2341_v38  ;;  %v2972_v38 = vld [vmem:[#allocation3 + $0xc9] sm:$0xff] }
 0x28e   : > { %4546 = vmatmul.mubr.msk.bf16.vlgmr.msra.gmra.mrb[20].mxu1 %vm385_vm1, %v5771_v48 }
 0x28f   : > { %4562 = vmatpush3.bf16.msra.mxu1 %v2675_v60  ;;  %4549 = vmatprep.mubr.msk.bf16.mxu1 %vm385_vm1, %v5773_v58 }
 0x290   : > { %4987 = vmatprep.subr.msk.bf16.mxu1 %vm573_vm4, %v4088_v63  ;;  %v3507_v63 = vsel %vm573_vm4, %v4124_v1, 0 }
 0x296   : > { %4550 = vmatmul.mubr.msk.bf16.gmra.mrb[24].mxu1 %vm385_vm1, %v5784_v8 }
 0x297   : > { %4553 = vmatprep.mubr.msk.bf16.mxu1 %vm385_vm1, %v5786_v0 }
 0x29e   : > { %4554 = vmatmul.mubr.msk.bf16.gmra.mrb[28].mxu1 %vm385_vm1, %v5792_v11 }
 0x29f   : > { %4557 = vmatprep.mubr.msk.bf16.mxu1 %vm385_vm1, %v5794_v13 }
 0x2a6   : > { %4558 = vmatmul.mubr.msk.bf16.gmra.mrb[32].mxu1 %vm385_vm1, %v5800_v20 }
 0x2a7   : > { %4563 = vmatprep.mubr.msk.bf16.mxu1 %vm385_vm1, %v2640_v21  ;;  %v3792_v21 = vld [vmem:[%s5226_s18 + $0x20] sm:$0xff] }
 0x2ae   : > { %4564 = vmatmul.mubr.msk.bf16.vlgmr.msra.gmra.mrb[20].mxu1 %vm385_vm1, %v2641_v54 }
 0x2af   : > { %4580 = vmatpush3.bf16.msra.mxu1 %v2842_v59  ;;  %4567 = vmatprep.mubr.msk.bf16.mxu1 %vm385_vm1, %v5805_v57 }
 0x2b0   : > { %4988 = vmatprep.subr.msk.bf16.mxu1 %vm573_vm4, %v4097_v24 }
 0x2b6   : > { %4568 = vmatmul.mubr.msk.bf16.gmra.mrb[24].mxu1 %vm385_vm1, %v5815_v31 }
 0x2b7   : > { %4571 = vmatprep.mubr.msk.bf16.mxu1 %vm385_vm1, %v5817_v34 }
 0x2be   : > { %4572 = vmatmul.mubr.msk.bf16.gmra.mrb[28].mxu1 %vm385_vm1, %v5823_v41 }
 0x2bf   : > { %4575 = vmatprep.mubr.msk.bf16.mxu1 %vm385_vm1, %v5825_v49 }
 0x2c6   : > { %4576 = vmatmul.mubr.msk.bf16.gmra.mrb[32].mxu1 %vm385_vm1, %v5831_v6 }
 0x2c7   : > { %4581 = vmatprep.mubr.msk.bf16.mxu1 %vm385_vm1, %v5771_v48  ;;  %v3138_v48 = vld [vmem:[#allocation3 + $0xca] sm:$0xff] }
 0x2c8   : > { %v3146_v60 = vpack.c.bf16 %v3138_v48, %v3137_v47 }
 0x2ce   : > { %4582 = vmatmul.mubr.msk.bf16.vlgmr.msra.gmra.mrb[20].mxu1 %vm385_vm1, %v5773_v58 }
 0x2cf   : > { %4598 = vmatpush3.bf16.msra.mxu1 %v3008_v7  ;;  %4585 = vmatprep.mubr.msk.bf16.mxu1 %vm385_vm1, %v5784_v8  ;;  %v3800_v7 = vld [vmem:[%s5226_s18 + $0x60] sm:$0xff] }
 0x2d0   : > { %4989 = vmatprep.subr.msk.bf16.mxu1 %vm573_vm4, %v4106_v12 }
 0x2d6   : > { %4586 = vmatmul.mubr.msk.bf16.gmra.mrb[24].mxu1 %vm385_vm1, %v5786_v0 }
 0x2d7   : > { %4589 = vmatprep.mubr.msk.bf16.mxu1 %vm385_vm1, %v5792_v11 }
 0x2de   : > { %4590 = vmatmul.mubr.msk.bf16.gmra.mrb[28].mxu1 %vm385_vm1, %v5794_v13 }
 0x2df   : > { %4593 = vmatprep.mubr.msk.bf16.mxu1 %vm385_vm1, %v5800_v20 }
 0x2e6   : > { %4594 = vmatmul.mubr.msk.bf16.gmra.mrb[32].mxu1 %vm385_vm1, %v2814_v42 }
 0x2e7   : > { %4599 = vmatprep.mubr.msk.bf16.mxu1 %vm385_vm1, %v5735_v35  ;;  %v2971_v35 = vld [vmem:[#allocation3 + $0xc1] sm:$0xff] }
 0x2e8   : > { %v2980_v45 = vpack.c.bf16 %v2972_v38, %v2971_v35 }
 0x2ee   : > { %4600 = vmatmul.mubr.msk.bf16.vlgmr.msra.gmra.mrb[20].mxu1 %vm385_vm1, %v5740_v2 }
 0x2ef   : > { %4616 = vmatpush3.bf16.msra.mxu1 %v3174_v33  ;;  %4603 = vmatprep.mubr.msk.bf16.mxu1 %vm385_vm1, %v5750_v61  ;;  %v3801_v33 = vld [vmem:[%s5226_s18 + $0x68] sm:$0xff] }
 0x2f0   : > { %4990 = vmatprep.subr.msk.bf16.mxu1 %vm573_vm4, %v4115_v43 }
 0x2f6   : > { %4604 = vmatmul.mubr.msk.bf16.gmra.mrb[24].mxu1 %vm385_vm1, %v5752_v62 }
 0x2f7   : > { %4607 = vmatprep.mubr.msk.bf16.mxu1 %vm385_vm1, %v5758_v26 }
 0x2fe   : > { %4608 = vmatmul.mubr.msk.bf16.gmra.mrb[28].mxu1 %vm385_vm1, %v5760_v27 }
 0x2ff   : > { %4611 = vmatprep.mubr.msk.bf16.mxu1 %vm385_vm1, %v5766_v44 }
 0x306   : > { %4612 = vmatmul.mubr.msk.bf16.gmra.mrb[32].mxu1 %vm385_vm1, %v2980_v45 }
 0x307   : > { %4617 = vmatprep.mubr.msk.bf16.mxu1 %vm385_vm1, %v2641_v54  ;;  %v3793_v54 = vld [vmem:[%s5226_s18 + $0x28] sm:$0xff] }
 0x30e   : > { %4618 = vmatmul.mubr.msk.bf16.vlgmr.msra.gmra.mrb[20].mxu1 %vm385_vm1, %v5805_v57 }
 0x30f   : > { %4634 = vmatpush3.bf16.msra.mxu1 %v3341_v46  ;;  %4621 = vmatprep.mubr.msk.bf16.mxu1 %vm385_vm1, %v5815_v31 }
 0x310   : > { %4991 = vmatprep.subr.msk.bf16.mxu1 %vm573_vm4, %v4124_v1 }
 0x316   : > { %4622 = vmatmul.mubr.msk.bf16.gmra.mrb[24].mxu1 %vm385_vm1, %v5817_v34 }
 0x317   : > { %4625 = vmatprep.mubr.msk.bf16.mxu1 %vm385_vm1, %v5823_v41 }
 0x31e   : > { %4626 = vmatmul.mubr.msk.bf16.gmra.mrb[28].mxu1 %vm385_vm1, %v5825_v49 }
 0x31f   : > { %4629 = vmatprep.mubr.msk.bf16.mxu1 %vm385_vm1, %v5831_v6 }
 0x326   : > { %4630 = vmatmul.mubr.msk.bf16.gmra.mrb[32].mxu1 %vm385_vm1, %v3146_v60 }
 0x327   : > { %4635 = vmatprep.mubr.msk.bf16.mxu1 %vm385_vm1, %v5773_v58  ;;  %v3304_v58 = vld [vmem:[#allocation3 + $0xd8] sm:$0xff] }
 0x328   : > { %v3313_v5 = vpack.c.bf16 %v3305_v4, %v3304_v58 }
 0x32e   : > { %4636 = vmatmul.mubr.msk.bf16.vlgmr.msra.gmra.mrb[20].mxu1 %vm385_vm1, %v5784_v8  ;;  %v3471_v8 = vld [vmem:[#allocation3 + $0xe1] sm:$0xff] }
 0x32f   : > { %4652 = vmatpush3.bf16.msra.mxu1 %v3507_v63  ;;  %4639 = vmatprep.mubr.msk.bf16.mxu1 %vm385_vm1, %v5786_v0  ;;  %v3788_v0 = vld [vmem:[%s5226_s18] sm:$0xff] }
 0x330   : > { %4992 = vmatprep.subr.msk.bf16.mxu1 %vm573_vm4, %v4133_v3 }
 0x336   : > { %4640 = vmatmul.mubr.msk.bf16.gmra.mrb[24].mxu1 %vm385_vm1, %v5792_v11  ;;  %v3789_v11 = vld [vmem:[%s5226_s18 + $0x8] sm:$0xff] }
 0x337   : > { %4643 = vmatprep.mubr.msk.bf16.mxu1 %vm385_vm1, %v5794_v13 }
 0x33e   : > { %4644 = vmatmul.mubr.msk.bf16.gmra.mrb[28].mxu1 %vm385_vm1, %v5800_v20  ;;  %v3794_v20 = vld [vmem:[%s5226_s18 + $0x30] sm:$0xff] }
 0x33f   : > { %4647 = vmatprep.mubr.msk.bf16.mxu1 %vm385_vm1, %v2814_v42 }
 0x346   : > { %4648 = vmatmul.mubr.msk.bf16.gmra.mrb[32].mxu1 %vm385_vm1, %v3313_v5 }
 0x347   : > { %4653 = vmatprep.mubr.msk.bf16.mxu1 %vm385_vm1, %v5740_v2  ;;  %v3470_v2 = vld [vmem:[#allocation3 + $0xd9] sm:$0xff] }
 0x34e   : > { %4654 = vmatmul.mubr.msk.bf16.vlgmr.msra.gmra.mrb[20].mxu1 %vm385_vm1, %v5750_v61  ;;  %v3479_v61 = vpack.c.bf16 %v3471_v8, %v3470_v2 }
 0x34f   : > { %4670 = vmatpush3.bf16.msra.mxu1 %v3673_v40  ;;  %4657 = vmatprep.mubr.msk.bf16.mxu1 %vm385_vm1, %v5752_v62  ;;  %v3636_v62 = vld [vmem:[#allocation3 + $0xda] sm:$0xff] }
 0x356   : > { %4658 = vmatmul.mubr.msk.bf16.gmra.mrb[24].mxu1 %vm385_vm1, %v5758_v26  ;;  %v3637_v26 = vld [vmem:[#allocation3 + $0xe2] sm:$0xff] }
 0x357   : > { %4661 = vmatprep.mubr.msk.bf16.mxu1 %vm385_vm1, %v5760_v27  ;;  %v3645_v27 = vpack.c.bf16 %v3637_v26, %v3636_v62 }
 0x35e   : > { %4662 = vmatmul.mubr.msk.bf16.gmra.mrb[28].mxu1 %vm385_vm1, %v5766_v44  ;;  %v3790_v44 = vld [vmem:[%s5226_s18 + $0x10] sm:$0xff] }
 0x35f   : > { %4665 = vmatprep.mubr.msk.bf16.mxu1 %vm385_vm1, %v2980_v45 }
 0x366   : > { %4666 = vmatmul.mubr.msk.bf16.gmra.mrb[32].mxu1 %vm385_vm1, %v3479_v61 }
 0x367   : > { %4671 = vmatprep.mubr.msk.bf16.mxu1 %vm385_vm1, %v5805_v57 }
 0x36e   : > { %4672 = vmatmul.mubr.msk.bf16.vlgmr.msra.gmra.mrb[20].mxu1 %vm385_vm1, %v5815_v31 }
 0x36f   : > { %4675 = vmatprep.mubr.msk.bf16.mxu1 %vm385_vm1, %v5817_v34  ;;  %v3799_v34 = vld [vmem:[%s5226_s18 + $0x58] sm:$0xff] }
 0x376   : > { %4676 = vmatmul.mubr.msk.bf16.gmra.mrb[24].mxu1 %vm385_vm1, %v5823_v41 }
 0x377   : > { %4679 = vmatprep.mubr.msk.bf16.mxu1 %vm385_vm1, %v5825_v49 }
 0x37e   : > { %4680 = vmatmul.mubr.msk.bf16.gmra.mrb[28].mxu1 %vm385_vm1, %v5831_v6  ;;  %v3802_v6 = vld [vmem:[%s5226_s18 + $0x70] sm:$0xff] }
 0x37f   : > { %4683 = vmatprep.mubr.msk.bf16.mxu1 %vm385_vm1, %v3146_v60 }
 0x386   : > { %4684 = vmatmul.mubr.msk.bf16.gmra.mrb[32].mxu1 %vm385_vm1, %v3645_v27 }
 0x441   : > { %v4673_v9 = vpop.f32.mrb[20].mxu1 }
 0x442   : > { %v3806_v10 = vadd.f32 %v4673_v9, %v3790_v44  ;;  %v3709_v51 = vpop.f32.mrb[21].mxu1 }
 0x443   : > { %v3804_v13 = vadd.f32 %v3788_v0, %v3709_v51  ;;  %v4674_v14 = vpop.f32.mrb[22].mxu1 }
 0x444   : > { %3822 = vst.msk [vmem:[%s5234_s30 + $0x10] sm:$0xff] %vm385_vm1, %v3806_v10  ;;  %v3807_v15 = vadd.f32 %v4674_v14, %v3791_v50  ;;  %v3712_v16 = vpop.f32.mrb[23].mxu1 }
 0x445   : > { %3820 = vst.msk [vmem:[%s5234_s30] sm:$0xff] %vm385_vm1, %v3804_v13  ;;  %v3805_v17 = vadd.f32 %v3789_v11, %v3712_v16 }
 0x446   : > { %3823 = vst.msk [vmem:[%s5234_s30 + $0x18] sm:$0xff] %vm385_vm1, %v3807_v15 }
 0x447   : > { %3821 = vst.msk [vmem:[%s5234_s30 + $0x8] sm:$0xff] %vm385_vm1, %v3805_v17 }
 0x449   : > { %v4677_v22 = vpop.f32.mrb[24].mxu1 }
 0x44a   : > { %v3810_v23 = vadd.f32 %v4677_v22, %v3794_v20  ;;  %v3725_v53 = vpop.f32.mrb[25].mxu1 }
 0x44b   : > { %v3808_v57 = vadd.f32 %v3792_v21, %v3725_v53  ;;  %v4678_v59 = vpop.f32.mrb[26].mxu1 }
 0x44c   : > { %3826 = vst.msk [vmem:[%s5234_s30 + $0x30] sm:$0xff] %vm385_vm1, %v3810_v23  ;;  %v3811_v24 = vadd.f32 %v4678_v59, %v3795_v52  ;;  %v3728_v25 = vpop.f32.mrb[27].mxu1 }
 0x44d   : > { %3824 = vst.msk [vmem:[%s5234_s30 + $0x20] sm:$0xff] %vm385_vm1, %v3808_v57  ;;  %v3809_v28 = vadd.f32 %v3793_v54, %v3728_v25 }
 0x44e   : > { %3827 = vst.msk [vmem:[%s5234_s30 + $0x38] sm:$0xff] %vm385_vm1, %v3811_v24 }
 0x44f   : > { %3825 = vst.msk [vmem:[%s5234_s30 + $0x28] sm:$0xff] %vm385_vm1, %v3809_v28 }
 0x451   : > { %v4681_v31 = vpop.f32.mrb[28].mxu1 }
 0x452   : > { %v3814_v36 = vadd.f32 %v4681_v31, %v3798_v29  ;;  %v3741_v18 = vpop.f32.mrb[29].mxu1 }
 0x453   : > { %v3812_v39 = vadd.f32 %v3796_v30, %v3741_v18  ;;  %v4682_v41 = vpop.f32.mrb[30].mxu1 }
 0x454   : > { %3830 = vst.msk [vmem:[%s5234_s30 + $0x50] sm:$0xff] %vm385_vm1, %v3814_v36  ;;  %v3815_v49 = vadd.f32 %v4682_v41, %v3799_v34  ;;  %v3744_v55 = vpop.f32.mrb[31].mxu1 }
 0x455   : > { %3828 = vst.msk [vmem:[%s5234_s30 + $0x40] sm:$0xff] %vm385_vm1, %v3812_v39  ;;  %v3813_v56 = vadd.f32 %v3797_v37, %v3744_v55 }
 0x456   : > { %3831 = vst.msk [vmem:[%s5234_s30 + $0x58] sm:$0xff] %vm385_vm1, %v3815_v49 }
 0x457   : > { %3829 = vst.msk [vmem:[%s5234_s30 + $0x48] sm:$0xff] %vm385_vm1, %v3813_v56 }
 0x459   : > { %v4685_v12 = vpop.f32.mrb[32].mxu1 }
 0x45a   : > { %v3818_v32 = vadd.f32 %v4685_v12, %v3802_v6  ;;  %v3757_v42 = vpop.f32.mrb[33].mxu1 }
 0x45b   : > { %v3816_v43 = vadd.f32 %v3800_v7, %v3757_v42  ;;  %v4686_v35 = vpop.f32.mrb[34].mxu1 }
 0x45c   : > { %3834 = vst.msk [vmem:[%s5234_s30 + $0x70] sm:$0xff] %vm385_vm1, %v3818_v32  ;;  %v3819_v38 = vadd.f32 %v4686_v35, %v3803_v19  ;;  %v3760_v45 = vpop.f32.mrb[35].mxu1 }
 0x45d   : > { %3832 = vst.msk [vmem:[%s5234_s30 + $0x60] sm:$0xff] %vm385_vm1, %v3816_v43  ;;  %v3817_v46 = vadd.f32 %v3801_v33, %v3760_v45 }
 0x45e   : > { %3835 = vst.msk [vmem:[%s5234_s30 + $0x78] sm:$0xff] %vm385_vm1, %v3819_v38 }
 0x45f   : > { %3833 = vst.msk [vmem:[%s5234_s30 + $0x68] sm:$0xff] %vm385_vm1, %v3817_v46 }
 0x460 PF: > { %s16_s25 = sadd.s32 1, %s5076_s25   ;;  %s6012_s21 = smov %s5068_s23 }
 0x461   : > { %p13_p11 = scmp.ge.s32.totalorder %s16_s25, 6   ;;  %s6013_s22 = smov %s5072_s24 }
 0x462   : > { %s6014_s23 = smov %s6017_s26  ;;  %s6015_s24 = smov %s6021_s27 }
 0x463   :  { %15 = sbr.rel (!%p13_p11) target bundleno = 3 (0x3), region = 124 }

</bundles_post_ra>
